<compile_context>
chip_gen: v5e
topology: v5e:2x2
jax: 0.10.0
libtpu: 0.0.40
codegen_flags: <defaults>
</compile_context>

<pallas_src>
import math

import jax
import jax.numpy as jnp
from jax.experimental import pallas as pl
from jax.experimental.pallas import tpu as pltpu

K = 7     # kernel_size
PAD = 3   # "same" padding for kernel_size == 7


def _round_up(x, m):
    return (x + m - 1) // m * m


def _vmem_capacity_bytes():
    try:
        cap = int(pltpu.get_tpu_info().vmem_capacity_bytes)
        if cap > 0:
            return cap
    except Exception:
        pass
    return 64 * 1024 * 1024   # conservative default (v7x-sized)


def _choose_blocks(N, C, HW, itemsize, vmem_cap):
    """Tile-padding- and double-buffering-aware block sizes."""
    sub = {4: 8, 2: 16, 1: 32}.get(itemsize, 8)    # sublane multiple per dtype
    lanes = _round_up(HW, 128)

    # Batch block: keep >= 2 steps on the (parallel) batch axis when possible
    # so both v7x TensorCores get work, while amortizing per-step overhead for
    # large N.  (v5e/v6e have a single TC; this is just tile sizing there.)
    b_cap = max(1, min(N // 2, 8)) if N >= 2 else 1
    b_blk = max(d for d in range(1, N + 1) if N % d == 0 and d <= b_cap)

    budget = vmem_cap // 3

    def fits(b, c):
        native = b * _round_up(c, sub) * lanes * itemsize   # one x buffer
        f32tmp = b * _round_up(c, 8) * lanes * 4            # f32 reduce temp
        return 2 * native + f32tmp <= budget                # 2x: double buffer

    divisors = [d for d in range(1, C + 1) if C % d == 0]
    while True:
        preferred = [d for d in divisors
                     if (d == C or d % 8 == 0) and fits(b_blk, d)]
        if preferred:
            return b_blk, max(preferred)
        fallback = [d for d in divisors if fits(b_blk, d)]
        if fallback:
            return b_blk, max(fallback)
        if b_blk == 1:
            return 1, 1
        b_blk = max(d for d in range(1, b_blk) if N % d == 0)


def _make_kernel(c_total, b_blk, c_blk, H, W):
    HW = H * W
    FLAT = (H + 2 * PAD) * W + 2 * PAD        # zero-haloed flat pooled map
    INTERIOR = PAD * W + PAD                  # flat offset of pooled[0, 0]
    inv_c = 1.0 / float(c_total)

    def kernel(w_ref, m_ref, x_ref, o_ref, sum_ref, max_ref, pad_avg, pad_max):
        # w_ref   : (2*K*K,) f32 conv1 weights in SMEM (OIHW flattened)
        # m_ref   : (K, HW)  f32 per-kw column-validity masks
        # x_ref   : (b_blk, c_blk, HW) input block (lane-dense)
        # o_ref   : (b_blk, HW) output block (channel dim squeezed)
        # sum_ref / max_ref : (b_blk, HW) f32 running channel reductions
        # pad_avg / pad_max : (b_blk, FLAT) zero-haloed flat pooled maps
        ct = pl.program_id(1)

        @pl.when(ct == 0)
        def _init():
            sum_ref[...] = jnp.zeros_like(sum_ref)
            max_ref[...] = jnp.full(max_ref.shape, -jnp.inf, max_ref.dtype)

        # --- running channel reduction (lane-dense, sublane-axis reduce) ----
        xb = x_ref[...]
        sum_ref[...] = sum_ref[...] + jnp.sum(xb.astype(jnp.float32), axis=1)
        max_ref[...] = jnp.maximum(
            max_ref[...], jnp.max(xb, axis=1).astype(jnp.float32))

        # --- finalize: 7x7 "same" conv over [mean, max] + sigmoid ----------
        @pl.when(ct == pl.num_programs(1) - 1)
        def _finalize():
            # Zero only the halo (the interior is fully overwritten below).
            halo = jnp.zeros((b_blk, INTERIOR), jnp.float32)
            pad_avg[:, :INTERIOR] = halo
            pad_avg[:, INTERIOR + HW:FLAT] = halo
            pad_max[:, :INTERIOR] = halo
            pad_max[:, INTERIOR + HW:FLAT] = halo
            pad_avg[:, INTERIOR:INTERIOR + HW] = sum_ref[...] * inv_c
            pad_max[:, INTERIOR:INTERIOR + HW] = max_ref[...]

            masks = m_ref[...]                              # (K, HW)
            acc = jnp.zeros((b_blk, HW), jnp.float32)
            for c, padr in enumerate((pad_avg, pad_max)):
                for kw in range(K):
                    inner = jnp.zeros((b_blk, HW), jnp.float32)
                    for kh in range(K):
                        wgt = w_ref[(c * K + kh) * K + kw]  # SMEM scalar
                        s = kh * W + kw                     # flat tap offset
                        inner = inner + wgt * padr[:, s:s + HW]
                    # per-kw mask zeroes the row-wrap contributions
                    acc = acc + masks[kw:kw + 1, :] * inner

            o_ref[...] = jax.nn.sigmoid(acc).astype(o_ref.dtype)

    return kernel


@jax.jit
def spatial_attention(x, w):
    """x: (N, C, H, W).  w: (1, 2, K, K) conv1 weights (OIHW, no bias)."""
    N, C, H, W = x.shape
    HW = H * W
    xf = x.reshape(N, C, HW)                        # metadata-only for NCHW
    w_flat = w.reshape(-1).astype(jnp.float32)      # (2*K*K,) -> SMEM

    # Column-validity masks for the 7 horizontal tap offsets in flat space.
    col = jnp.arange(HW, dtype=jnp.int32) % W
    masks = jnp.stack(
        [((col + kw - PAD >= 0) & (col + kw - PAD < W)).astype(jnp.float32)
         for kw in range(K)], axis=0)               # (K, HW)

    vmem_cap = _vmem_capacity_bytes()
    b_blk, c_blk = _choose_blocks(N, C, HW, x.dtype.itemsize, vmem_cap)
    kernel = _make_kernel(C, b_blk, c_blk, H, W)
    flat = (H + 2 * PAD) * W + 2 * PAD
    vmem_limit = max(32 * 1024 * 1024,
                     min(int(vmem_cap * 0.85), 100 * 1024 * 1024))

    out = pl.pallas_call(
        kernel,
        out_shape=jax.ShapeDtypeStruct((N, 1, HW), x.dtype),
        grid=(N // b_blk, C // c_blk),
        in_specs=[
            pl.BlockSpec(memory_space=pltpu.MemorySpace.SMEM),       # weights
            pl.BlockSpec((K, HW), lambda b, ct: (0, 0)),             # masks
            pl.BlockSpec((b_blk, c_blk, HW), lambda b, ct: (b, ct, 0)),  # x
        ],
        out_specs=pl.BlockSpec((b_blk, None, HW), lambda b, ct: (b, 0, 0)),
        scratch_shapes=[
            pltpu.VMEM((b_blk, HW), jnp.float32),     # running channel sum
            pltpu.VMEM((b_blk, HW), jnp.float32),     # running channel max
            pltpu.VMEM((b_blk, flat), jnp.float32),   # flat padded mean map
            pltpu.VMEM((b_blk, flat), jnp.float32),   # flat padded max map
        ],
        compiler_params=pltpu.CompilerParams(
            dimension_semantics=("parallel", "arbitrary"),
            vmem_limit_bytes=vmem_limit),
    )(w_flat, masks, xf)

    return out.reshape(N, 1, H, W)


def spatial_attention_reference(x, w):
    avg = jnp.mean(x, axis=1, keepdims=True)
    mx = jnp.max(x, axis=1, keepdims=True)
    feat = jnp.concatenate([avg, mx], axis=1)
    out = jax.lax.conv_general_dilated(
        feat, w, window_strides=(1, 1),
        padding=((PAD, PAD), (PAD, PAD)),
        dimension_numbers=("NCHW", "OIHW", "NCHW"),
        precision=jax.lax.Precision.HIGHEST)
    return jax.nn.sigmoid(out)


if __name__ == "__main__":
    key = jax.random.PRNGKey(0)
    kx, kw_key = jax.random.split(key)

    N, C, H, W = 2, 4, 16, 16
    x = jax.random.normal(kx, (N, C, H, W), jnp.float32)

    # conv1 weights (nn.Conv2d(2, 1, 7, bias=False)), PyTorch default init
    bound = 1.0 / math.sqrt(2 * K * K)
    w = jax.random.uniform(kw_key, (1, 2, K, K), jnp.float32, -bound, bound)

    out = jax.block_until_ready(spatial_attention(x, w))
    ref = spatial_attention_reference(x, w)

    assert out.shape == (N, 1, H, W), out.shape
    max_err = float(jnp.max(jnp.abs(out - ref)))
    assert jnp.allclose(out, ref, atol=1e-4, rtol=1e-4), max_err

    print("KERNEL_OK")
</pallas_src>

<mosaic_0001>
module attributes {stable_mosaic.version = 11 : i64} {
  func.func @kernel(%arg0: i32, %arg1: i32, %arg2: memref<98xf32, #tpu.memory_space<smem>>, %arg3: memref<7x256xf32, #tpu.memory_space<vmem>>, %arg4: memref<1x4x256xf32, #tpu.memory_space<vmem>>, %arg5: memref<1x1x256xf32, #tpu.memory_space<vmem>>, %arg6: memref<1x256xf32, #tpu.memory_space<vmem>>, %arg7: memref<1x256xf32, #tpu.memory_space<vmem>>, %arg8: memref<1x358xf32, #tpu.memory_space<vmem>>, %arg9: memref<1x358xf32, #tpu.memory_space<vmem>>) attributes {dimension_semantics = [#tpu.dimension_semantics<parallel>, #tpu.dimension_semantics<arbitrary>], iteration_bounds = array<i64: 2, 1>, scalar_prefetch = 0 : i64, scratch_operands = 4 : i64, tpu.core_type = #tpu.core_type<tc>, window_params = [{transform_indices = @transform_0, window_bounds = array<i64: 98>}, {pipeline_mode = #tpu.pipeline_mode<synchronous>, transform_indices = @transform_1, window_bounds = array<i64: 7, 256>}, {transform_indices = @transform_2, window_bounds = array<i64: 1, 4, 256>}, {transform_indices = @transform_3, window_bounds = array<i64: 1, 1, 256>}]} {
    %c0_i32 = arith.constant 0 : i32
    %0 = arith.cmpi eq, %arg1, %c0_i32 : i32
    %1 = arith.extui %0 : i1 to i32
    %c0_i32_0 = arith.constant 0 : i32
    %2 = arith.cmpi ne, %1, %c0_i32_0 : i32
    scf.if %2 {
      %cst_14 = arith.constant 0.000000e+00 : f32
      %15 = vector.broadcast %cst_14 : f32 to vector<1x256xf32>
      %c0_15 = arith.constant 0 : index
      %c0_16 = arith.constant 0 : index
      %16 = vector.load %arg6[%c0_15, %c0_16] : memref<1x256xf32, #tpu.memory_space<vmem>>, vector<1x256xf32>
      tpu.vector_store %arg6[%c0_15, %c0_16], %15 {strides = array<i32>} : memref<1x256xf32, #tpu.memory_space<vmem>>, vector<1x256xf32>,
      %cst_17 = arith.constant 0xFF800000 : f32
      %17 = vector.broadcast %cst_17 : f32 to vector<1x256xf32>
      %c0_18 = arith.constant 0 : index
      %c0_19 = arith.constant 0 : index
      %18 = vector.load %arg7[%c0_18, %c0_19] : memref<1x256xf32, #tpu.memory_space<vmem>>, vector<1x256xf32>
      tpu.vector_store %arg7[%c0_18, %c0_19], %17 {strides = array<i32>} : memref<1x256xf32, #tpu.memory_space<vmem>>, vector<1x256xf32>,
    } else {
    }
    %c0 = arith.constant 0 : index
    %c0_1 = arith.constant 0 : index
    %c0_2 = arith.constant 0 : index
    %3 = vector.load %arg4[%c0, %c0_1, %c0_2] : memref<1x4x256xf32, #tpu.memory_space<vmem>>, vector<1x4x256xf32>
    %c0_3 = arith.constant 0 : index
    %c0_4 = arith.constant 0 : index
    %4 = vector.load %arg6[%c0_3, %c0_4] : memref<1x256xf32, #tpu.memory_space<vmem>>, vector<1x256xf32>
    %cst = arith.constant dense<0.000000e+00> : vector<1x256xf32>
    %5 = vector.multi_reduction <add>, %3, %cst [1] : vector<1x4x256xf32> to vector<1x256xf32>
    %6 = arith.addf %4, %5 : vector<1x256xf32>
    %c0_5 = arith.constant 0 : index
    %c0_6 = arith.constant 0 : index
    %7 = vector.load %arg6[%c0_5, %c0_6] : memref<1x256xf32, #tpu.memory_space<vmem>>, vector<1x256xf32>
    tpu.vector_store %arg6[%c0_5, %c0_6], %6 {strides = array<i32>} : memref<1x256xf32, #tpu.memory_space<vmem>>, vector<1x256xf32>,
    %c0_7 = arith.constant 0 : index
    %c0_8 = arith.constant 0 : index
    %8 = vector.load %arg7[%c0_7, %c0_8] : memref<1x256xf32, #tpu.memory_space<vmem>>, vector<1x256xf32>
    %cst_9 = arith.constant dense<0xFF800000> : vector<1x256xf32>
    %9 = vector.multi_reduction <maximumf>, %3, %cst_9 [1] : vector<1x4x256xf32> to vector<1x256xf32>
    %10 = arith.maximumf %8, %9 : vector<1x256xf32>
    %c0_10 = arith.constant 0 : index
    %c0_11 = arith.constant 0 : index
    %11 = vector.load %arg7[%c0_10, %c0_11] : memref<1x256xf32, #tpu.memory_space<vmem>>, vector<1x256xf32>
    tpu.vector_store %arg7[%c0_10, %c0_11], %10 {strides = array<i32>} : memref<1x256xf32, #tpu.memory_space<vmem>>, vector<1x256xf32>,
    %c0_i32_12 = arith.constant 0 : i32
    %12 = arith.cmpi eq, %arg1, %c0_i32_12 : i32
    %13 = arith.extui %12 : i1 to i32
    %c0_i32_13 = arith.constant 0 : i32
    %14 = arith.cmpi ne, %13, %c0_i32_13 : i32
    scf.if %14 {
      %cst_14 = arith.constant 0.000000e+00 : f32
      %15 = vector.broadcast %cst_14 : f32 to vector<1x51xf32>
      %c0_15 = arith.constant 0 : index
      %c0_16 = arith.constant 0 : index
      %16 = vector.load %arg8[%c0_15, %c0_16] : memref<1x358xf32, #tpu.memory_space<vmem>>, vector<1x51xf32>
      tpu.vector_store %arg8[%c0_15, %c0_16], %15 {strides = array<i32>} : memref<1x358xf32, #tpu.memory_space<vmem>>, vector<1x51xf32>,
      %c0_17 = arith.constant 0 : index
      %c307 = arith.constant 307 : index
      %17 = vector.load %arg8[%c0_17, %c307] : memref<1x358xf32, #tpu.memory_space<vmem>>, vector<1x51xf32>
      tpu.vector_store %arg8[%c0_17, %c307], %15 {strides = array<i32>} : memref<1x358xf32, #tpu.memory_space<vmem>>, vector<1x51xf32>,
      %c0_18 = arith.constant 0 : index
      %c0_19 = arith.constant 0 : index
      %18 = vector.load %arg9[%c0_18, %c0_19] : memref<1x358xf32, #tpu.memory_space<vmem>>, vector<1x51xf32>
      tpu.vector_store %arg9[%c0_18, %c0_19], %15 {strides = array<i32>} : memref<1x358xf32, #tpu.memory_space<vmem>>, vector<1x51xf32>,
      %c0_20 = arith.constant 0 : index
      %c307_21 = arith.constant 307 : index
      %19 = vector.load %arg9[%c0_20, %c307_21] : memref<1x358xf32, #tpu.memory_space<vmem>>, vector<1x51xf32>
      tpu.vector_store %arg9[%c0_20, %c307_21], %15 {strides = array<i32>} : memref<1x358xf32, #tpu.memory_space<vmem>>, vector<1x51xf32>,
      %c0_22 = arith.constant 0 : index
      %c0_23 = arith.constant 0 : index
      %20 = vector.load %arg6[%c0_22, %c0_23] : memref<1x256xf32, #tpu.memory_space<vmem>>, vector<1x256xf32>
      %cst_24 = arith.constant 2.500000e-01 : f32
      %21 = vector.broadcast %cst_24 : f32 to vector<1x256xf32>
      %22 = arith.mulf %20, %21 : vector<1x256xf32>
      %c0_25 = arith.constant 0 : index
      %c51 = arith.constant 51 : index
      %23 = vector.load %arg8[%c0_25, %c51] : memref<1x358xf32, #tpu.memory_space<vmem>>, vector<1x256xf32>
      tpu.vector_store %arg8[%c0_25, %c51], %22 {strides = array<i32>} : memref<1x358xf32, #tpu.memory_space<vmem>>, vector<1x256xf32>,
      %c0_26 = arith.constant 0 : index
      %c0_27 = arith.constant 0 : index
      %24 = vector.load %arg7[%c0_26, %c0_27] : memref<1x256xf32, #tpu.memory_space<vmem>>, vector<1x256xf32>
      %c0_28 = arith.constant 0 : index
      %c51_29 = arith.constant 51 : index
      %25 = vector.load %arg9[%c0_28, %c51_29] : memref<1x358xf32, #tpu.memory_space<vmem>>, vector<1x256xf32>
      tpu.vector_store %arg9[%c0_28, %c51_29], %24 {strides = array<i32>} : memref<1x358xf32, #tpu.memory_space<vmem>>, vector<1x256xf32>,
      %c0_30 = arith.constant 0 : index
      %c0_31 = arith.constant 0 : index
      %26 = vector.load %arg3[%c0_30, %c0_31] : memref<7x256xf32, #tpu.memory_space<vmem>>, vector<7x256xf32>
      %cst_32 = arith.constant 0.000000e+00 : f32
      %27 = vector.broadcast %cst_32 : f32 to vector<1x256xf32>
      %cst_33 = arith.constant 0.000000e+00 : f32
      %28 = vector.broadcast %cst_33 : f32 to vector<1x256xf32>
      %c0_34 = arith.constant 0 : index
      %29 = memref.load %arg2[%c0_34] : memref<98xf32, #tpu.memory_space<smem>>
      %c0_35 = arith.constant 0 : index
      %c0_36 = arith.constant 0 : index
      %30 = vector.load %arg8[%c0_35, %c0_36] : memref<1x358xf32, #tpu.memory_space<vmem>>, vector<1x256xf32>
      %31 = vector.broadcast %29 : f32 to vector<1x256xf32>
      %32 = arith.mulf %31, %30 : vector<1x256xf32>
      %33 = arith.addf %28, %32 : vector<1x256xf32>
      %c7 = arith.constant 7 : index
      %34 = memref.load %arg2[%c7] : memref<98xf32, #tpu.memory_space<smem>>
      %c0_37 = arith.constant 0 : index
      %c16 = arith.constant 16 : index
      %35 = vector.load %arg8[%c0_37, %c16] : memref<1x358xf32, #tpu.memory_space<vmem>>, vector<1x256xf32>
      %36 = vector.broadcast %34 : f32 to vector<1x256xf32>
      %37 = arith.mulf %36, %35 : vector<1x256xf32>
      %38 = arith.addf %33, %37 : vector<1x256xf32>
      %c14 = arith.constant 14 : index
      %39 = memref.load %arg2[%c14] : memref<98xf32, #tpu.memory_space<smem>>
      %c0_38 = arith.constant 0 : index
      %c32 = arith.constant 32 : index
      %40 = vector.load %arg8[%c0_38, %c32] : memref<1x358xf32, #tpu.memory_space<vmem>>, vector<1x256xf32>
      %41 = vector.broadcast %39 : f32 to vector<1x256xf32>
      %42 = arith.mulf %41, %40 : vector<1x256xf32>
      %43 = arith.addf %38, %42 : vector<1x256xf32>
      %c21 = arith.constant 21 : index
      %44 = memref.load %arg2[%c21] : memref<98xf32, #tpu.memory_space<smem>>
      %c0_39 = arith.constant 0 : index
      %c48 = arith.constant 48 : index
      %45 = vector.load %arg8[%c0_39, %c48] : memref<1x358xf32, #tpu.memory_space<vmem>>, vector<1x256xf32>
      %46 = vector.broadcast %44 : f32 to vector<1x256xf32>
      %47 = arith.mulf %46, %45 : vector<1x256xf32>
      %48 = arith.addf %43, %47 : vector<1x256xf32>
      %c28 = arith.constant 28 : index
      %49 = memref.load %arg2[%c28] : memref<98xf32, #tpu.memory_space<smem>>
      %c0_40 = arith.constant 0 : index
      %c64 = arith.constant 64 : index
      %50 = vector.load %arg8[%c0_40, %c64] : memref<1x358xf32, #tpu.memory_space<vmem>>, vector<1x256xf32>
      %51 = vector.broadcast %49 : f32 to vector<1x256xf32>
      %52 = arith.mulf %51, %50 : vector<1x256xf32>
      %53 = arith.addf %48, %52 : vector<1x256xf32>
      %c35 = arith.constant 35 : index
      %54 = memref.load %arg2[%c35] : memref<98xf32, #tpu.memory_space<smem>>
      %c0_41 = arith.constant 0 : index
      %c80 = arith.constant 80 : index
      %55 = vector.load %arg8[%c0_41, %c80] : memref<1x358xf32, #tpu.memory_space<vmem>>, vector<1x256xf32>
      %56 = vector.broadcast %54 : f32 to vector<1x256xf32>
      %57 = arith.mulf %56, %55 : vector<1x256xf32>
      %58 = arith.addf %53, %57 : vector<1x256xf32>
      %c42 = arith.constant 42 : index
      %59 = memref.load %arg2[%c42] : memref<98xf32, #tpu.memory_space<smem>>
      %c0_42 = arith.constant 0 : index
      %c96 = arith.constant 96 : index
      %60 = vector.load %arg8[%c0_42, %c96] : memref<1x358xf32, #tpu.memory_space<vmem>>, vector<1x256xf32>
      %61 = vector.broadcast %59 : f32 to vector<1x256xf32>
      %62 = arith.mulf %61, %60 : vector<1x256xf32>
      %63 = arith.addf %58, %62 : vector<1x256xf32>
      %64 = vector.extract_strided_slice %26 {offsets = [0, 0], sizes = [1, 256], strides = [1, 1]} : vector<7x256xf32> to vector<1x256xf32>
      %65 = arith.mulf %64, %63 : vector<1x256xf32>
      %66 = arith.addf %27, %65 : vector<1x256xf32>
      %cst_43 = arith.constant 0.000000e+00 : f32
      %67 = vector.broadcast %cst_43 : f32 to vector<1x256xf32>
      %c1 = arith.constant 1 : index
      %68 = memref.load %arg2[%c1] : memref<98xf32, #tpu.memory_space<smem>>
      %c0_44 = arith.constant 0 : index
      %c1_45 = arith.constant 1 : index
      %69 = vector.load %arg8[%c0_44, %c1_45] : memref<1x358xf32, #tpu.memory_space<vmem>>, vector<1x256xf32>
      %70 = vector.broadcast %68 : f32 to vector<1x256xf32>
      %71 = arith.mulf %70, %69 : vector<1x256xf32>
      %72 = arith.addf %67, %71 : vector<1x256xf32>
      %c8 = arith.constant 8 : index
      %73 = memref.load %arg2[%c8] : memref<98xf32, #tpu.memory_space<smem>>
      %c0_46 = arith.constant 0 : index
      %c17 = arith.constant 17 : index
      %74 = vector.load %arg8[%c0_46, %c17] : memref<1x358xf32, #tpu.memory_space<vmem>>, vector<1x256xf32>
      %75 = vector.broadcast %73 : f32 to vector<1x256xf32>
      %76 = arith.mulf %75, %74 : vector<1x256xf32>
      %77 = arith.addf %72, %76 : vector<1x256xf32>
      %c15 = arith.constant 15 : index
      %78 = memref.load %arg2[%c15] : memref<98xf32, #tpu.memory_space<smem>>
      %c0_47 = arith.constant 0 : index
      %c33 = arith.constant 33 : index
      %79 = vector.load %arg8[%c0_47, %c33] : memref<1x358xf32, #tpu.memory_space<vmem>>, vector<1x256xf32>
      %80 = vector.broadcast %78 : f32 to vector<1x256xf32>
      %81 = arith.mulf %80, %79 : vector<1x256xf32>
      %82 = arith.addf %77, %81 : vector<1x256xf32>
      %c22 = arith.constant 22 : index
      %83 = memref.load %arg2[%c22] : memref<98xf32, #tpu.memory_space<smem>>
      %c0_48 = arith.constant 0 : index
      %c49 = arith.constant 49 : index
      %84 = vector.load %arg8[%c0_48, %c49] : memref<1x358xf32, #tpu.memory_space<vmem>>, vector<1x256xf32>
      %85 = vector.broadcast %83 : f32 to vector<1x256xf32>
      %86 = arith.mulf %85, %84 : vector<1x256xf32>
      %87 = arith.addf %82, %86 : vector<1x256xf32>
      %c29 = arith.constant 29 : index
      %88 = memref.load %arg2[%c29] : memref<98xf32, #tpu.memory_space<smem>>
      %c0_49 = arith.constant 0 : index
      %c65 = arith.constant 65 : index
      %89 = vector.load %arg8[%c0_49, %c65] : memref<1x358xf32, #tpu.memory_space<vmem>>, vector<1x256xf32>
      %90 = vector.broadcast %88 : f32 to vector<1x256xf32>
      %91 = arith.mulf %90, %89 : vector<1x256xf32>
      %92 = arith.addf %87, %91 : vector<1x256xf32>
      %c36 = arith.constant 36 : index
      %93 = memref.load %arg2[%c36] : memref<98xf32, #tpu.memory_space<smem>>
      %c0_50 = arith.constant 0 : index
      %c81 = arith.constant 81 : index
      %94 = vector.load %arg8[%c0_50, %c81] : memref<1x358xf32, #tpu.memory_space<vmem>>, vector<1x256xf32>
      %95 = vector.broadcast %93 : f32 to vector<1x256xf32>
      %96 = arith.mulf %95, %94 : vector<1x256xf32>
      %97 = arith.addf %92, %96 : vector<1x256xf32>
      %c43 = arith.constant 43 : index
      %98 = memref.load %arg2[%c43] : memref<98xf32, #tpu.memory_space<smem>>
      %c0_51 = arith.constant 0 : index
      %c97 = arith.constant 97 : index
      %99 = vector.load %arg8[%c0_51, %c97] : memref<1x358xf32, #tpu.memory_space<vmem>>, vector<1x256xf32>
      %100 = vector.broadcast %98 : f32 to vector<1x256xf32>
      %101 = arith.mulf %100, %99 : vector<1x256xf32>
      %102 = arith.addf %97, %101 : vector<1x256xf32>
      %103 = vector.extract_strided_slice %26 {offsets = [1, 0], sizes = [1, 256], strides = [1, 1]} : vector<7x256xf32> to vector<1x256xf32>
      %104 = arith.mulf %103, %102 : vector<1x256xf32>
      %105 = arith.addf %66, %104 : vector<1x256xf32>
      %cst_52 = arith.constant 0.000000e+00 : f32
      %106 = vector.broadcast %cst_52 : f32 to vector<1x256xf32>
      %c2 = arith.constant 2 : index
      %107 = memref.load %arg2[%c2] : memref<98xf32, #tpu.memory_space<smem>>
      %c0_53 = arith.constant 0 : index
      %c2_54 = arith.constant 2 : index
      %108 = vector.load %arg8[%c0_53, %c2_54] : memref<1x358xf32, #tpu.memory_space<vmem>>, vector<1x256xf32>
      %109 = vector.broadcast %107 : f32 to vector<1x256xf32>
      %110 = arith.mulf %109, %108 : vector<1x256xf32>
      %111 = arith.addf %106, %110 : vector<1x256xf32>
      %c9 = arith.constant 9 : index
      %112 = memref.load %arg2[%c9] : memref<98xf32, #tpu.memory_space<smem>>
      %c0_55 = arith.constant 0 : index
      %c18 = arith.constant 18 : index
      %113 = vector.load %arg8[%c0_55, %c18] : memref<1x358xf32, #tpu.memory_space<vmem>>, vector<1x256xf32>
      %114 = vector.broadcast %112 : f32 to vector<1x256xf32>
      %115 = arith.mulf %114, %113 : vector<1x256xf32>
      %116 = arith.addf %111, %115 : vector<1x256xf32>
      %c16_56 = arith.constant 16 : index
      %117 = memref.load %arg2[%c16_56] : memref<98xf32, #tpu.memory_space<smem>>
      %c0_57 = arith.constant 0 : index
      %c34 = arith.constant 34 : index
      %118 = vector.load %arg8[%c0_57, %c34] : memref<1x358xf32, #tpu.memory_space<vmem>>, vector<1x256xf32>
      %119 = vector.broadcast %117 : f32 to vector<1x256xf32>
      %120 = arith.mulf %119, %118 : vector<1x256xf32>
      %121 = arith.addf %116, %120 : vector<1x256xf32>
      %c23 = arith.constant 23 : index
      %122 = memref.load %arg2[%c23] : memref<98xf32, #tpu.memory_space<smem>>
      %c0_58 = arith.constant 0 : index
      %c50 = arith.constant 50 : index
      %123 = vector.load %arg8[%c0_58, %c50] : memref<1x358xf32, #tpu.memory_space<vmem>>, vector<1x256xf32>
      %124 = vector.broadcast %122 : f32 to vector<1x256xf32>
      %125 = arith.mulf %124, %123 : vector<1x256xf32>
      %126 = arith.addf %121, %125 : vector<1x256xf32>
      %c30 = arith.constant 30 : index
      %127 = memref.load %arg2[%c30] : memref<98xf32, #tpu.memory_space<smem>>
      %c0_59 = arith.constant 0 : index
      %c66 = arith.constant 66 : index
      %128 = vector.load %arg8[%c0_59, %c66] : memref<1x358xf32, #tpu.memory_space<vmem>>, vector<1x256xf32>
      %129 = vector.broadcast %127 : f32 to vector<1x256xf32>
      %130 = arith.mulf %129, %128 : vector<1x256xf32>
      %131 = arith.addf %126, %130 : vector<1x256xf32>
      %c37 = arith.constant 37 : index
      %132 = memref.load %arg2[%c37] : memref<98xf32, #tpu.memory_space<smem>>
      %c0_60 = arith.constant 0 : index
      %c82 = arith.constant 82 : index
      %133 = vector.load %arg8[%c0_60, %c82] : memref<1x358xf32, #tpu.memory_space<vmem>>, vector<1x256xf32>
      %134 = vector.broadcast %132 : f32 to vector<1x256xf32>
      %135 = arith.mulf %134, %133 : vector<1x256xf32>
      %136 = arith.addf %131, %135 : vector<1x256xf32>
      %c44 = arith.constant 44 : index
      %137 = memref.load %arg2[%c44] : memref<98xf32, #tpu.memory_space<smem>>
      %c0_61 = arith.constant 0 : index
      %c98 = arith.constant 98 : index
      %138 = vector.load %arg8[%c0_61, %c98] : memref<1x358xf32, #tpu.memory_space<vmem>>, vector<1x256xf32>
      %139 = vector.broadcast %137 : f32 to vector<1x256xf32>
      %140 = arith.mulf %139, %138 : vector<1x256xf32>
      %141 = arith.addf %136, %140 : vector<1x256xf32>
      %142 = vector.extract_strided_slice %26 {offsets = [2, 0], sizes = [1, 256], strides = [1, 1]} : vector<7x256xf32> to vector<1x256xf32>
      %143 = arith.mulf %142, %141 : vector<1x256xf32>
      %144 = arith.addf %105, %143 : vector<1x256xf32>
      %cst_62 = arith.constant 0.000000e+00 : f32
      %145 = vector.broadcast %cst_62 : f32 to vector<1x256xf32>
      %c3 = arith.constant 3 : index
      %146 = memref.load %arg2[%c3] : memref<98xf32, #tpu.memory_space<smem>>
      %c0_63 = arith.constant 0 : index
      %c3_64 = arith.constant 3 : index
      %147 = vector.load %arg8[%c0_63, %c3_64] : memref<1x358xf32, #tpu.memory_space<vmem>>, vector<1x256xf32>
      %148 = vector.broadcast %146 : f32 to vector<1x256xf32>
      %149 = arith.mulf %148, %147 : vector<1x256xf32>
      %150 = arith.addf %145, %149 : vector<1x256xf32>
      %c10 = arith.constant 10 : index
      %151 = memref.load %arg2[%c10] : memref<98xf32, #tpu.memory_space<smem>>
      %c0_65 = arith.constant 0 : index
      %c19 = arith.constant 19 : index
      %152 = vector.load %arg8[%c0_65, %c19] : memref<1x358xf32, #tpu.memory_space<vmem>>, vector<1x256xf32>
      %153 = vector.broadcast %151 : f32 to vector<1x256xf32>
      %154 = arith.mulf %153, %152 : vector<1x256xf32>
      %155 = arith.addf %150, %154 : vector<1x256xf32>
      %c17_66 = arith.constant 17 : index
      %156 = memref.load %arg2[%c17_66] : memref<98xf32, #tpu.memory_space<smem>>
      %c0_67 = arith.constant 0 : index
      %c35_68 = arith.constant 35 : index
      %157 = vector.load %arg8[%c0_67, %c35_68] : memref<1x358xf32, #tpu.memory_space<vmem>>, vector<1x256xf32>
      %158 = vector.broadcast %156 : f32 to vector<1x256xf32>
      %159 = arith.mulf %158, %157 : vector<1x256xf32>
      %160 = arith.addf %155, %159 : vector<1x256xf32>
      %c24 = arith.constant 24 : index
      %161 = memref.load %arg2[%c24] : memref<98xf32, #tpu.memory_space<smem>>
      %c0_69 = arith.constant 0 : index
      %c51_70 = arith.constant 51 : index
      %162 = vector.load %arg8[%c0_69, %c51_70] : memref<1x358xf32, #tpu.memory_space<vmem>>, vector<1x256xf32>
      %163 = vector.broadcast %161 : f32 to vector<1x256xf32>
      %164 = arith.mulf %163, %162 : vector<1x256xf32>
      %165 = arith.addf %160, %164 : vector<1x256xf32>
      %c31 = arith.constant 31 : index
      %166 = memref.load %arg2[%c31] : memref<98xf32, #tpu.memory_space<smem>>
      %c0_71 = arith.constant 0 : index
      %c67 = arith.constant 67 : index
      %167 = vector.load %arg8[%c0_71, %c67] : memref<1x358xf32, #tpu.memory_space<vmem>>, vector<1x256xf32>
      %168 = vector.broadcast %166 : f32 to vector<1x256xf32>
      %169 = arith.mulf %168, %167 : vector<1x256xf32>
      %170 = arith.addf %165, %169 : vector<1x256xf32>
      %c38 = arith.constant 38 : index
      %171 = memref.load %arg2[%c38] : memref<98xf32, #tpu.memory_space<smem>>
      %c0_72 = arith.constant 0 : index
      %c83 = arith.constant 83 : index
      %172 = vector.load %arg8[%c0_72, %c83] : memref<1x358xf32, #tpu.memory_space<vmem>>, vector<1x256xf32>
      %173 = vector.broadcast %171 : f32 to vector<1x256xf32>
      %174 = arith.mulf %173, %172 : vector<1x256xf32>
      %175 = arith.addf %170, %174 : vector<1x256xf32>
      %c45 = arith.constant 45 : index
      %176 = memref.load %arg2[%c45] : memref<98xf32, #tpu.memory_space<smem>>
      %c0_73 = arith.constant 0 : index
      %c99 = arith.constant 99 : index
      %177 = vector.load %arg8[%c0_73, %c99] : memref<1x358xf32, #tpu.memory_space<vmem>>, vector<1x256xf32>
      %178 = vector.broadcast %176 : f32 to vector<1x256xf32>
      %179 = arith.mulf %178, %177 : vector<1x256xf32>
      %180 = arith.addf %175, %179 : vector<1x256xf32>
      %181 = vector.extract_strided_slice %26 {offsets = [3, 0], sizes = [1, 256], strides = [1, 1]} : vector<7x256xf32> to vector<1x256xf32>
      %182 = arith.mulf %181, %180 : vector<1x256xf32>
      %183 = arith.addf %144, %182 : vector<1x256xf32>
      %cst_74 = arith.constant 0.000000e+00 : f32
      %184 = vector.broadcast %cst_74 : f32 to vector<1x256xf32>
      %c4 = arith.constant 4 : index
      %185 = memref.load %arg2[%c4] : memref<98xf32, #tpu.memory_space<smem>>
      %c0_75 = arith.constant 0 : index
      %c4_76 = arith.constant 4 : index
      %186 = vector.load %arg8[%c0_75, %c4_76] : memref<1x358xf32, #tpu.memory_space<vmem>>, vector<1x256xf32>
      %187 = vector.broadcast %185 : f32 to vector<1x256xf32>
      %188 = arith.mulf %187, %186 : vector<1x256xf32>
      %189 = arith.addf %184, %188 : vector<1x256xf32>
      %c11 = arith.constant 11 : index
      %190 = memref.load %arg2[%c11] : memref<98xf32, #tpu.memory_space<smem>>
      %c0_77 = arith.constant 0 : index
      %c20 = arith.constant 20 : index
      %191 = vector.load %arg8[%c0_77, %c20] : memref<1x358xf32, #tpu.memory_space<vmem>>, vector<1x256xf32>
      %192 = vector.broadcast %190 : f32 to vector<1x256xf32>
      %193 = arith.mulf %192, %191 : vector<1x256xf32>
      %194 = arith.addf %189, %193 : vector<1x256xf32>
      %c18_78 = arith.constant 18 : index
      %195 = memref.load %arg2[%c18_78] : memref<98xf32, #tpu.memory_space<smem>>
      %c0_79 = arith.constant 0 : index
      %c36_80 = arith.constant 36 : index
      %196 = vector.load %arg8[%c0_79, %c36_80] : memref<1x358xf32, #tpu.memory_space<vmem>>, vector<1x256xf32>
      %197 = vector.broadcast %195 : f32 to vector<1x256xf32>
      %198 = arith.mulf %197, %196 : vector<1x256xf32>
      %199 = arith.addf %194, %198 : vector<1x256xf32>
      %c25 = arith.constant 25 : index
      %200 = memref.load %arg2[%c25] : memref<98xf32, #tpu.memory_space<smem>>
      %c0_81 = arith.constant 0 : index
      %c52 = arith.constant 52 : index
      %201 = vector.load %arg8[%c0_81, %c52] : memref<1x358xf32, #tpu.memory_space<vmem>>, vector<1x256xf32>
      %202 = vector.broadcast %200 : f32 to vector<1x256xf32>
      %203 = arith.mulf %202, %201 : vector<1x256xf32>
      %204 = arith.addf %199, %203 : vector<1x256xf32>
      %c32_82 = arith.constant 32 : index
      %205 = memref.load %arg2[%c32_82] : memref<98xf32, #tpu.memory_space<smem>>
      %c0_83 = arith.constant 0 : index
      %c68 = arith.constant 68 : index
      %206 = vector.load %arg8[%c0_83, %c68] : memref<1x358xf32, #tpu.memory_space<vmem>>, vector<1x256xf32>
      %207 = vector.broadcast %205 : f32 to vector<1x256xf32>
      %208 = arith.mulf %207, %206 : vector<1x256xf32>
      %209 = arith.addf %204, %208 : vector<1x256xf32>
      %c39 = arith.constant 39 : index
      %210 = memref.load %arg2[%c39] : memref<98xf32, #tpu.memory_space<smem>>
      %c0_84 = arith.constant 0 : index
      %c84 = arith.constant 84 : index
      %211 = vector.load %arg8[%c0_84, %c84] : memref<1x358xf32, #tpu.memory_space<vmem>>, vector<1x256xf32>
      %212 = vector.broadcast %210 : f32 to vector<1x256xf32>
      %213 = arith.mulf %212, %211 : vector<1x256xf32>
      %214 = arith.addf %209, %213 : vector<1x256xf32>
      %c46 = arith.constant 46 : index
      %215 = memref.load %arg2[%c46] : memref<98xf32, #tpu.memory_space<smem>>
      %c0_85 = arith.constant 0 : index
      %c100 = arith.constant 100 : index
      %216 = vector.load %arg8[%c0_85, %c100] : memref<1x358xf32, #tpu.memory_space<vmem>>, vector<1x256xf32>
      %217 = vector.broadcast %215 : f32 to vector<1x256xf32>
      %218 = arith.mulf %217, %216 : vector<1x256xf32>
      %219 = arith.addf %214, %218 : vector<1x256xf32>
      %220 = vector.extract_strided_slice %26 {offsets = [4, 0], sizes = [1, 256], strides = [1, 1]} : vector<7x256xf32> to vector<1x256xf32>
      %221 = arith.mulf %220, %219 : vector<1x256xf32>
      %222 = arith.addf %183, %221 : vector<1x256xf32>
      %cst_86 = arith.constant 0.000000e+00 : f32
      %223 = vector.broadcast %cst_86 : f32 to vector<1x256xf32>
      %c5 = arith.constant 5 : index
      %224 = memref.load %arg2[%c5] : memref<98xf32, #tpu.memory_space<smem>>
      %c0_87 = arith.constant 0 : index
      %c5_88 = arith.constant 5 : index
      %225 = vector.load %arg8[%c0_87, %c5_88] : memref<1x358xf32, #tpu.memory_space<vmem>>, vector<1x256xf32>
      %226 = vector.broadcast %224 : f32 to vector<1x256xf32>
      %227 = arith.mulf %226, %225 : vector<1x256xf32>
      %228 = arith.addf %223, %227 : vector<1x256xf32>
      %c12 = arith.constant 12 : index
      %229 = memref.load %arg2[%c12] : memref<98xf32, #tpu.memory_space<smem>>
      %c0_89 = arith.constant 0 : index
      %c21_90 = arith.constant 21 : index
      %230 = vector.load %arg8[%c0_89, %c21_90] : memref<1x358xf32, #tpu.memory_space<vmem>>, vector<1x256xf32>
      %231 = vector.broadcast %229 : f32 to vector<1x256xf32>
      %232 = arith.mulf %231, %230 : vector<1x256xf32>
      %233 = arith.addf %228, %232 : vector<1x256xf32>
      %c19_91 = arith.constant 19 : index
      %234 = memref.load %arg2[%c19_91] : memref<98xf32, #tpu.memory_space<smem>>
      %c0_92 = arith.constant 0 : index
      %c37_93 = arith.constant 37 : index
      %235 = vector.load %arg8[%c0_92, %c37_93] : memref<1x358xf32, #tpu.memory_space<vmem>>, vector<1x256xf32>
      %236 = vector.broadcast %234 : f32 to vector<1x256xf32>
      %237 = arith.mulf %236, %235 : vector<1x256xf32>
      %238 = arith.addf %233, %237 : vector<1x256xf32>
      %c26 = arith.constant 26 : index
      %239 = memref.load %arg2[%c26] : memref<98xf32, #tpu.memory_space<smem>>
      %c0_94 = arith.constant 0 : index
      %c53 = arith.constant 53 : index
      %240 = vector.load %arg8[%c0_94, %c53] : memref<1x358xf32, #tpu.memory_space<vmem>>, vector<1x256xf32>
      %241 = vector.broadcast %239 : f32 to vector<1x256xf32>
      %242 = arith.mulf %241, %240 : vector<1x256xf32>
      %243 = arith.addf %238, %242 : vector<1x256xf32>
      %c33_95 = arith.constant 33 : index
      %244 = memref.load %arg2[%c33_95] : memref<98xf32, #tpu.memory_space<smem>>
      %c0_96 = arith.constant 0 : index
      %c69 = arith.constant 69 : index
      %245 = vector.load %arg8[%c0_96, %c69] : memref<1x358xf32, #tpu.memory_space<vmem>>, vector<1x256xf32>
      %246 = vector.broadcast %244 : f32 to vector<1x256xf32>
      %247 = arith.mulf %246, %245 : vector<1x256xf32>
      %248 = arith.addf %243, %247 : vector<1x256xf32>
      %c40 = arith.constant 40 : index
      %249 = memref.load %arg2[%c40] : memref<98xf32, #tpu.memory_space<smem>>
      %c0_97 = arith.constant 0 : index
      %c85 = arith.constant 85 : index
      %250 = vector.load %arg8[%c0_97, %c85] : memref<1x358xf32, #tpu.memory_space<vmem>>, vector<1x256xf32>
      %251 = vector.broadcast %249 : f32 to vector<1x256xf32>
      %252 = arith.mulf %251, %250 : vector<1x256xf32>
      %253 = arith.addf %248, %252 : vector<1x256xf32>
      %c47 = arith.constant 47 : index
      %254 = memref.load %arg2[%c47] : memref<98xf32, #tpu.memory_space<smem>>
      %c0_98 = arith.constant 0 : index
      %c101 = arith.constant 101 : index
      %255 = vector.load %arg8[%c0_98, %c101] : memref<1x358xf32, #tpu.memory_space<vmem>>, vector<1x256xf32>
      %256 = vector.broadcast %254 : f32 to vector<1x256xf32>
      %257 = arith.mulf %256, %255 : vector<1x256xf32>
      %258 = arith.addf %253, %257 : vector<1x256xf32>
      %259 = vector.extract_strided_slice %26 {offsets = [5, 0], sizes = [1, 256], strides = [1, 1]} : vector<7x256xf32> to vector<1x256xf32>
      %260 = arith.mulf %259, %258 : vector<1x256xf32>
      %261 = arith.addf %222, %260 : vector<1x256xf32>
      %cst_99 = arith.constant 0.000000e+00 : f32
      %262 = vector.broadcast %cst_99 : f32 to vector<1x256xf32>
      %c6 = arith.constant 6 : index
      %263 = memref.load %arg2[%c6] : memref<98xf32, #tpu.memory_space<smem>>
      %c0_100 = arith.constant 0 : index
      %c6_101 = arith.constant 6 : index
      %264 = vector.load %arg8[%c0_100, %c6_101] : memref<1x358xf32, #tpu.memory_space<vmem>>, vector<1x256xf32>
      %265 = vector.broadcast %263 : f32 to vector<1x256xf32>
      %266 = arith.mulf %265, %264 : vector<1x256xf32>
      %267 = arith.addf %262, %266 : vector<1x256xf32>
      %c13 = arith.constant 13 : index
      %268 = memref.load %arg2[%c13] : memref<98xf32, #tpu.memory_space<smem>>
      %c0_102 = arith.constant 0 : index
      %c22_103 = arith.constant 22 : index
      %269 = vector.load %arg8[%c0_102, %c22_103] : memref<1x358xf32, #tpu.memory_space<vmem>>, vector<1x256xf32>
      %270 = vector.broadcast %268 : f32 to vector<1x256xf32>
      %271 = arith.mulf %270, %269 : vector<1x256xf32>
      %272 = arith.addf %267, %271 : vector<1x256xf32>
      %c20_104 = arith.constant 20 : index
      %273 = memref.load %arg2[%c20_104] : memref<98xf32, #tpu.memory_space<smem>>
      %c0_105 = arith.constant 0 : index
      %c38_106 = arith.constant 38 : index
      %274 = vector.load %arg8[%c0_105, %c38_106] : memref<1x358xf32, #tpu.memory_space<vmem>>, vector<1x256xf32>
      %275 = vector.broadcast %273 : f32 to vector<1x256xf32>
      %276 = arith.mulf %275, %274 : vector<1x256xf32>
      %277 = arith.addf %272, %276 : vector<1x256xf32>
      %c27 = arith.constant 27 : index
      %278 = memref.load %arg2[%c27] : memref<98xf32, #tpu.memory_space<smem>>
      %c0_107 = arith.constant 0 : index
      %c54 = arith.constant 54 : index
      %279 = vector.load %arg8[%c0_107, %c54] : memref<1x358xf32, #tpu.memory_space<vmem>>, vector<1x256xf32>
      %280 = vector.broadcast %278 : f32 to vector<1x256xf32>
      %281 = arith.mulf %280, %279 : vector<1x256xf32>
      %282 = arith.addf %277, %281 : vector<1x256xf32>
      %c34_108 = arith.constant 34 : index
      %283 = memref.load %arg2[%c34_108] : memref<98xf32, #tpu.memory_space<smem>>
      %c0_109 = arith.constant 0 : index
      %c70 = arith.constant 70 : index
      %284 = vector.load %arg8[%c0_109, %c70] : memref<1x358xf32, #tpu.memory_space<vmem>>, vector<1x256xf32>
      %285 = vector.broadcast %283 : f32 to vector<1x256xf32>
      %286 = arith.mulf %285, %284 : vector<1x256xf32>
      %287 = arith.addf %282, %286 : vector<1x256xf32>
      %c41 = arith.constant 41 : index
      %288 = memref.load %arg2[%c41] : memref<98xf32, #tpu.memory_space<smem>>
      %c0_110 = arith.constant 0 : index
      %c86 = arith.constant 86 : index
      %289 = vector.load %arg8[%c0_110, %c86] : memref<1x358xf32, #tpu.memory_space<vmem>>, vector<1x256xf32>
      %290 = vector.broadcast %288 : f32 to vector<1x256xf32>
      %291 = arith.mulf %290, %289 : vector<1x256xf32>
      %292 = arith.addf %287, %291 : vector<1x256xf32>
      %c48_111 = arith.constant 48 : index
      %293 = memref.load %arg2[%c48_111] : memref<98xf32, #tpu.memory_space<smem>>
      %c0_112 = arith.constant 0 : index
      %c102 = arith.constant 102 : index
      %294 = vector.load %arg8[%c0_112, %c102] : memref<1x358xf32, #tpu.memory_space<vmem>>, vector<1x256xf32>
      %295 = vector.broadcast %293 : f32 to vector<1x256xf32>
      %296 = arith.mulf %295, %294 : vector<1x256xf32>
      %297 = arith.addf %292, %296 : vector<1x256xf32>
      %298 = vector.extract_strided_slice %26 {offsets = [6, 0], sizes = [1, 256], strides = [1, 1]} : vector<7x256xf32> to vector<1x256xf32>
      %299 = arith.mulf %298, %297 : vector<1x256xf32>
      %300 = arith.addf %261, %299 : vector<1x256xf32>
      %cst_113 = arith.constant 0.000000e+00 : f32
      %301 = vector.broadcast %cst_113 : f32 to vector<1x256xf32>
      %c49_114 = arith.constant 49 : index
      %302 = memref.load %arg2[%c49_114] : memref<98xf32, #tpu.memory_space<smem>>
      %c0_115 = arith.constant 0 : index
      %c0_116 = arith.constant 0 : index
      %303 = vector.load %arg9[%c0_115, %c0_116] : memref<1x358xf32, #tpu.memory_space<vmem>>, vector<1x256xf32>
      %304 = vector.broadcast %302 : f32 to vector<1x256xf32>
      %305 = arith.mulf %304, %303 : vector<1x256xf32>
      %306 = arith.addf %301, %305 : vector<1x256xf32>
      %c56 = arith.constant 56 : index
      %307 = memref.load %arg2[%c56] : memref<98xf32, #tpu.memory_space<smem>>
      %c0_117 = arith.constant 0 : index
      %c16_118 = arith.constant 16 : index
      %308 = vector.load %arg9[%c0_117, %c16_118] : memref<1x358xf32, #tpu.memory_space<vmem>>, vector<1x256xf32>
      %309 = vector.broadcast %307 : f32 to vector<1x256xf32>
      %310 = arith.mulf %309, %308 : vector<1x256xf32>
      %311 = arith.addf %306, %310 : vector<1x256xf32>
      %c63 = arith.constant 63 : index
      %312 = memref.load %arg2[%c63] : memref<98xf32, #tpu.memory_space<smem>>
      %c0_119 = arith.constant 0 : index
      %c32_120 = arith.constant 32 : index
      %313 = vector.load %arg9[%c0_119, %c32_120] : memref<1x358xf32, #tpu.memory_space<vmem>>, vector<1x256xf32>
      %314 = vector.broadcast %312 : f32 to vector<1x256xf32>
      %315 = arith.mulf %314, %313 : vector<1x256xf32>
      %316 = arith.addf %311, %315 : vector<1x256xf32>
      %c70_121 = arith.constant 70 : index
      %317 = memref.load %arg2[%c70_121] : memref<98xf32, #tpu.memory_space<smem>>
      %c0_122 = arith.constant 0 : index
      %c48_123 = arith.constant 48 : index
      %318 = vector.load %arg9[%c0_122, %c48_123] : memref<1x358xf32, #tpu.memory_space<vmem>>, vector<1x256xf32>
      %319 = vector.broadcast %317 : f32 to vector<1x256xf32>
      %320 = arith.mulf %319, %318 : vector<1x256xf32>
      %321 = arith.addf %316, %320 : vector<1x256xf32>
      %c77 = arith.constant 77 : index
      %322 = memref.load %arg2[%c77] : memref<98xf32, #tpu.memory_space<smem>>
      %c0_124 = arith.constant 0 : index
      %c64_125 = arith.constant 64 : index
      %323 = vector.load %arg9[%c0_124, %c64_125] : memref<1x358xf32, #tpu.memory_space<vmem>>, vector<1x256xf32>
      %324 = vector.broadcast %322 : f32 to vector<1x256xf32>
      %325 = arith.mulf %324, %323 : vector<1x256xf32>
      %326 = arith.addf %321, %325 : vector<1x256xf32>
      %c84_126 = arith.constant 84 : index
      %327 = memref.load %arg2[%c84_126] : memref<98xf32, #tpu.memory_space<smem>>
      %c0_127 = arith.constant 0 : index
      %c80_128 = arith.constant 80 : index
      %328 = vector.load %arg9[%c0_127, %c80_128] : memref<1x358xf32, #tpu.memory_space<vmem>>, vector<1x256xf32>
      %329 = vector.broadcast %327 : f32 to vector<1x256xf32>
      %330 = arith.mulf %329, %328 : vector<1x256xf32>
      %331 = arith.addf %326, %330 : vector<1x256xf32>
      %c91 = arith.constant 91 : index
      %332 = memref.load %arg2[%c91] : memref<98xf32, #tpu.memory_space<smem>>
      %c0_129 = arith.constant 0 : index
      %c96_130 = arith.constant 96 : index
      %333 = vector.load %arg9[%c0_129, %c96_130] : memref<1x358xf32, #tpu.memory_space<vmem>>, vector<1x256xf32>
      %334 = vector.broadcast %332 : f32 to vector<1x256xf32>
      %335 = arith.mulf %334, %333 : vector<1x256xf32>
      %336 = arith.addf %331, %335 : vector<1x256xf32>
      %337 = vector.extract_strided_slice %26 {offsets = [0, 0], sizes = [1, 256], strides = [1, 1]} : vector<7x256xf32> to vector<1x256xf32>
      %338 = arith.mulf %337, %336 : vector<1x256xf32>
      %339 = arith.addf %300, %338 : vector<1x256xf32>
      %cst_131 = arith.constant 0.000000e+00 : f32
      %340 = vector.broadcast %cst_131 : f32 to vector<1x256xf32>
      %c50_132 = arith.constant 50 : index
      %341 = memref.load %arg2[%c50_132] : memref<98xf32, #tpu.memory_space<smem>>
      %c0_133 = arith.constant 0 : index
      %c1_134 = arith.constant 1 : index
      %342 = vector.load %arg9[%c0_133, %c1_134] : memref<1x358xf32, #tpu.memory_space<vmem>>, vector<1x256xf32>
      %343 = vector.broadcast %341 : f32 to vector<1x256xf32>
      %344 = arith.mulf %343, %342 : vector<1x256xf32>
      %345 = arith.addf %340, %344 : vector<1x256xf32>
      %c57 = arith.constant 57 : index
      %346 = memref.load %arg2[%c57] : memref<98xf32, #tpu.memory_space<smem>>
      %c0_135 = arith.constant 0 : index
      %c17_136 = arith.constant 17 : index
      %347 = vector.load %arg9[%c0_135, %c17_136] : memref<1x358xf32, #tpu.memory_space<vmem>>, vector<1x256xf32>
      %348 = vector.broadcast %346 : f32 to vector<1x256xf32>
      %349 = arith.mulf %348, %347 : vector<1x256xf32>
      %350 = arith.addf %345, %349 : vector<1x256xf32>
      %c64_137 = arith.constant 64 : index
      %351 = memref.load %arg2[%c64_137] : memref<98xf32, #tpu.memory_space<smem>>
      %c0_138 = arith.constant 0 : index
      %c33_139 = arith.constant 33 : index
      %352 = vector.load %arg9[%c0_138, %c33_139] : memref<1x358xf32, #tpu.memory_space<vmem>>, vector<1x256xf32>
      %353 = vector.broadcast %351 : f32 to vector<1x256xf32>
      %354 = arith.mulf %353, %352 : vector<1x256xf32>
      %355 = arith.addf %350, %354 : vector<1x256xf32>
      %c71 = arith.constant 71 : index
      %356 = memref.load %arg2[%c71] : memref<98xf32, #tpu.memory_space<smem>>
      %c0_140 = arith.constant 0 : index
      %c49_141 = arith.constant 49 : index
      %357 = vector.load %arg9[%c0_140, %c49_141] : memref<1x358xf32, #tpu.memory_space<vmem>>, vector<1x256xf32>
      %358 = vector.broadcast %356 : f32 to vector<1x256xf32>
      %359 = arith.mulf %358, %357 : vector<1x256xf32>
      %360 = arith.addf %355, %359 : vector<1x256xf32>
      %c78 = arith.constant 78 : index
      %361 = memref.load %arg2[%c78] : memref<98xf32, #tpu.memory_space<smem>>
      %c0_142 = arith.constant 0 : index
      %c65_143 = arith.constant 65 : index
      %362 = vector.load %arg9[%c0_142, %c65_143] : memref<1x358xf32, #tpu.memory_space<vmem>>, vector<1x256xf32>
      %363 = vector.broadcast %361 : f32 to vector<1x256xf32>
      %364 = arith.mulf %363, %362 : vector<1x256xf32>
      %365 = arith.addf %360, %364 : vector<1x256xf32>
      %c85_144 = arith.constant 85 : index
      %366 = memref.load %arg2[%c85_144] : memref<98xf32, #tpu.memory_space<smem>>
      %c0_145 = arith.constant 0 : index
      %c81_146 = arith.constant 81 : index
      %367 = vector.load %arg9[%c0_145, %c81_146] : memref<1x358xf32, #tpu.memory_space<vmem>>, vector<1x256xf32>
      %368 = vector.broadcast %366 : f32 to vector<1x256xf32>
      %369 = arith.mulf %368, %367 : vector<1x256xf32>
      %370 = arith.addf %365, %369 : vector<1x256xf32>
      %c92 = arith.constant 92 : index
      %371 = memref.load %arg2[%c92] : memref<98xf32, #tpu.memory_space<smem>>
      %c0_147 = arith.constant 0 : index
      %c97_148 = arith.constant 97 : index
      %372 = vector.load %arg9[%c0_147, %c97_148] : memref<1x358xf32, #tpu.memory_space<vmem>>, vector<1x256xf32>
      %373 = vector.broadcast %371 : f32 to vector<1x256xf32>
      %374 = arith.mulf %373, %372 : vector<1x256xf32>
      %375 = arith.addf %370, %374 : vector<1x256xf32>
      %376 = vector.extract_strided_slice %26 {offsets = [1, 0], sizes = [1, 256], strides = [1, 1]} : vector<7x256xf32> to vector<1x256xf32>
      %377 = arith.mulf %376, %375 : vector<1x256xf32>
      %378 = arith.addf %339, %377 : vector<1x256xf32>
      %cst_149 = arith.constant 0.000000e+00 : f32
      %379 = vector.broadcast %cst_149 : f32 to vector<1x256xf32>
      %c51_150 = arith.constant 51 : index
      %380 = memref.load %arg2[%c51_150] : memref<98xf32, #tpu.memory_space<smem>>
      %c0_151 = arith.constant 0 : index
      %c2_152 = arith.constant 2 : index
      %381 = vector.load %arg9[%c0_151, %c2_152] : memref<1x358xf32, #tpu.memory_space<vmem>>, vector<1x256xf32>
      %382 = vector.broadcast %380 : f32 to vector<1x256xf32>
      %383 = arith.mulf %382, %381 : vector<1x256xf32>
      %384 = arith.addf %379, %383 : vector<1x256xf32>
      %c58 = arith.constant 58 : index
      %385 = memref.load %arg2[%c58] : memref<98xf32, #tpu.memory_space<smem>>
      %c0_153 = arith.constant 0 : index
      %c18_154 = arith.constant 18 : index
      %386 = vector.load %arg9[%c0_153, %c18_154] : memref<1x358xf32, #tpu.memory_space<vmem>>, vector<1x256xf32>
      %387 = vector.broadcast %385 : f32 to vector<1x256xf32>
      %388 = arith.mulf %387, %386 : vector<1x256xf32>
      %389 = arith.addf %384, %388 : vector<1x256xf32>
      %c65_155 = arith.constant 65 : index
      %390 = memref.load %arg2[%c65_155] : memref<98xf32, #tpu.memory_space<smem>>
      %c0_156 = arith.constant 0 : index
      %c34_157 = arith.constant 34 : index
      %391 = vector.load %arg9[%c0_156, %c34_157] : memref<1x358xf32, #tpu.memory_space<vmem>>, vector<1x256xf32>
      %392 = vector.broadcast %390 : f32 to vector<1x256xf32>
      %393 = arith.mulf %392, %391 : vector<1x256xf32>
      %394 = arith.addf %389, %393 : vector<1x256xf32>
      %c72 = arith.constant 72 : index
      %395 = memref.load %arg2[%c72] : memref<98xf32, #tpu.memory_space<smem>>
      %c0_158 = arith.constant 0 : index
      %c50_159 = arith.constant 50 : index
      %396 = vector.load %arg9[%c0_158, %c50_159] : memref<1x358xf32, #tpu.memory_space<vmem>>, vector<1x256xf32>
      %397 = vector.broadcast %395 : f32 to vector<1x256xf32>
      %398 = arith.mulf %397, %396 : vector<1x256xf32>
      %399 = arith.addf %394, %398 : vector<1x256xf32>
      %c79 = arith.constant 79 : index
      %400 = memref.load %arg2[%c79] : memref<98xf32, #tpu.memory_space<smem>>
      %c0_160 = arith.constant 0 : index
      %c66_161 = arith.constant 66 : index
      %401 = vector.load %arg9[%c0_160, %c66_161] : memref<1x358xf32, #tpu.memory_space<vmem>>, vector<1x256xf32>
      %402 = vector.broadcast %400 : f32 to vector<1x256xf32>
      %403 = arith.mulf %402, %401 : vector<1x256xf32>
      %404 = arith.addf %399, %403 : vector<1x256xf32>
      %c86_162 = arith.constant 86 : index
      %405 = memref.load %arg2[%c86_162] : memref<98xf32, #tpu.memory_space<smem>>
      %c0_163 = arith.constant 0 : index
      %c82_164 = arith.constant 82 : index
      %406 = vector.load %arg9[%c0_163, %c82_164] : memref<1x358xf32, #tpu.memory_space<vmem>>, vector<1x256xf32>
      %407 = vector.broadcast %405 : f32 to vector<1x256xf32>
      %408 = arith.mulf %407, %406 : vector<1x256xf32>
      %409 = arith.addf %404, %408 : vector<1x256xf32>
      %c93 = arith.constant 93 : index
      %410 = memref.load %arg2[%c93] : memref<98xf32, #tpu.memory_space<smem>>
      %c0_165 = arith.constant 0 : index
      %c98_166 = arith.constant 98 : index
      %411 = vector.load %arg9[%c0_165, %c98_166] : memref<1x358xf32, #tpu.memory_space<vmem>>, vector<1x256xf32>
      %412 = vector.broadcast %410 : f32 to vector<1x256xf32>
      %413 = arith.mulf %412, %411 : vector<1x256xf32>
      %414 = arith.addf %409, %413 : vector<1x256xf32>
      %415 = vector.extract_strided_slice %26 {offsets = [2, 0], sizes = [1, 256], strides = [1, 1]} : vector<7x256xf32> to vector<1x256xf32>
      %416 = arith.mulf %415, %414 : vector<1x256xf32>
      %417 = arith.addf %378, %416 : vector<1x256xf32>
      %cst_167 = arith.constant 0.000000e+00 : f32
      %418 = vector.broadcast %cst_167 : f32 to vector<1x256xf32>
      %c52_168 = arith.constant 52 : index
      %419 = memref.load %arg2[%c52_168] : memref<98xf32, #tpu.memory_space<smem>>
      %c0_169 = arith.constant 0 : index
      %c3_170 = arith.constant 3 : index
      %420 = vector.load %arg9[%c0_169, %c3_170] : memref<1x358xf32, #tpu.memory_space<vmem>>, vector<1x256xf32>
      %421 = vector.broadcast %419 : f32 to vector<1x256xf32>
      %422 = arith.mulf %421, %420 : vector<1x256xf32>
      %423 = arith.addf %418, %422 : vector<1x256xf32>
      %c59 = arith.constant 59 : index
      %424 = memref.load %arg2[%c59] : memref<98xf32, #tpu.memory_space<smem>>
      %c0_171 = arith.constant 0 : index
      %c19_172 = arith.constant 19 : index
      %425 = vector.load %arg9[%c0_171, %c19_172] : memref<1x358xf32, #tpu.memory_space<vmem>>, vector<1x256xf32>
      %426 = vector.broadcast %424 : f32 to vector<1x256xf32>
      %427 = arith.mulf %426, %425 : vector<1x256xf32>
      %428 = arith.addf %423, %427 : vector<1x256xf32>
      %c66_173 = arith.constant 66 : index
      %429 = memref.load %arg2[%c66_173] : memref<98xf32, #tpu.memory_space<smem>>
      %c0_174 = arith.constant 0 : index
      %c35_175 = arith.constant 35 : index
      %430 = vector.load %arg9[%c0_174, %c35_175] : memref<1x358xf32, #tpu.memory_space<vmem>>, vector<1x256xf32>
      %431 = vector.broadcast %429 : f32 to vector<1x256xf32>
      %432 = arith.mulf %431, %430 : vector<1x256xf32>
      %433 = arith.addf %428, %432 : vector<1x256xf32>
      %c73 = arith.constant 73 : index
      %434 = memref.load %arg2[%c73] : memref<98xf32, #tpu.memory_space<smem>>
      %c0_176 = arith.constant 0 : index
      %c51_177 = arith.constant 51 : index
      %435 = vector.load %arg9[%c0_176, %c51_177] : memref<1x358xf32, #tpu.memory_space<vmem>>, vector<1x256xf32>
      %436 = vector.broadcast %434 : f32 to vector<1x256xf32>
      %437 = arith.mulf %436, %435 : vector<1x256xf32>
      %438 = arith.addf %433, %437 : vector<1x256xf32>
      %c80_178 = arith.constant 80 : index
      %439 = memref.load %arg2[%c80_178] : memref<98xf32, #tpu.memory_space<smem>>
      %c0_179 = arith.constant 0 : index
      %c67_180 = arith.constant 67 : index
      %440 = vector.load %arg9[%c0_179, %c67_180] : memref<1x358xf32, #tpu.memory_space<vmem>>, vector<1x256xf32>
      %441 = vector.broadcast %439 : f32 to vector<1x256xf32>
      %442 = arith.mulf %441, %440 : vector<1x256xf32>
      %443 = arith.addf %438, %442 : vector<1x256xf32>
      %c87 = arith.constant 87 : index
      %444 = memref.load %arg2[%c87] : memref<98xf32, #tpu.memory_space<smem>>
      %c0_181 = arith.constant 0 : index
      %c83_182 = arith.constant 83 : index
      %445 = vector.load %arg9[%c0_181, %c83_182] : memref<1x358xf32, #tpu.memory_space<vmem>>, vector<1x256xf32>
      %446 = vector.broadcast %444 : f32 to vector<1x256xf32>
      %447 = arith.mulf %446, %445 : vector<1x256xf32>
      %448 = arith.addf %443, %447 : vector<1x256xf32>
      %c94 = arith.constant 94 : index
      %449 = memref.load %arg2[%c94] : memref<98xf32, #tpu.memory_space<smem>>
      %c0_183 = arith.constant 0 : index
      %c99_184 = arith.constant 99 : index
      %450 = vector.load %arg9[%c0_183, %c99_184] : memref<1x358xf32, #tpu.memory_space<vmem>>, vector<1x256xf32>
      %451 = vector.broadcast %449 : f32 to vector<1x256xf32>
      %452 = arith.mulf %451, %450 : vector<1x256xf32>
      %453 = arith.addf %448, %452 : vector<1x256xf32>
      %454 = vector.extract_strided_slice %26 {offsets = [3, 0], sizes = [1, 256], strides = [1, 1]} : vector<7x256xf32> to vector<1x256xf32>
      %455 = arith.mulf %454, %453 : vector<1x256xf32>
      %456 = arith.addf %417, %455 : vector<1x256xf32>
      %cst_185 = arith.constant 0.000000e+00 : f32
      %457 = vector.broadcast %cst_185 : f32 to vector<1x256xf32>
      %c53_186 = arith.constant 53 : index
      %458 = memref.load %arg2[%c53_186] : memref<98xf32, #tpu.memory_space<smem>>
      %c0_187 = arith.constant 0 : index
      %c4_188 = arith.constant 4 : index
      %459 = vector.load %arg9[%c0_187, %c4_188] : memref<1x358xf32, #tpu.memory_space<vmem>>, vector<1x256xf32>
      %460 = vector.broadcast %458 : f32 to vector<1x256xf32>
      %461 = arith.mulf %460, %459 : vector<1x256xf32>
      %462 = arith.addf %457, %461 : vector<1x256xf32>
      %c60 = arith.constant 60 : index
      %463 = memref.load %arg2[%c60] : memref<98xf32, #tpu.memory_space<smem>>
      %c0_189 = arith.constant 0 : index
      %c20_190 = arith.constant 20 : index
      %464 = vector.load %arg9[%c0_189, %c20_190] : memref<1x358xf32, #tpu.memory_space<vmem>>, vector<1x256xf32>
      %465 = vector.broadcast %463 : f32 to vector<1x256xf32>
      %466 = arith.mulf %465, %464 : vector<1x256xf32>
      %467 = arith.addf %462, %466 : vector<1x256xf32>
      %c67_191 = arith.constant 67 : index
      %468 = memref.load %arg2[%c67_191] : memref<98xf32, #tpu.memory_space<smem>>
      %c0_192 = arith.constant 0 : index
      %c36_193 = arith.constant 36 : index
      %469 = vector.load %arg9[%c0_192, %c36_193] : memref<1x358xf32, #tpu.memory_space<vmem>>, vector<1x256xf32>
      %470 = vector.broadcast %468 : f32 to vector<1x256xf32>
      %471 = arith.mulf %470, %469 : vector<1x256xf32>
      %472 = arith.addf %467, %471 : vector<1x256xf32>
      %c74 = arith.constant 74 : index
      %473 = memref.load %arg2[%c74] : memref<98xf32, #tpu.memory_space<smem>>
      %c0_194 = arith.constant 0 : index
      %c52_195 = arith.constant 52 : index
      %474 = vector.load %arg9[%c0_194, %c52_195] : memref<1x358xf32, #tpu.memory_space<vmem>>, vector<1x256xf32>
      %475 = vector.broadcast %473 : f32 to vector<1x256xf32>
      %476 = arith.mulf %475, %474 : vector<1x256xf32>
      %477 = arith.addf %472, %476 : vector<1x256xf32>
      %c81_196 = arith.constant 81 : index
      %478 = memref.load %arg2[%c81_196] : memref<98xf32, #tpu.memory_space<smem>>
      %c0_197 = arith.constant 0 : index
      %c68_198 = arith.constant 68 : index
      %479 = vector.load %arg9[%c0_197, %c68_198] : memref<1x358xf32, #tpu.memory_space<vmem>>, vector<1x256xf32>
      %480 = vector.broadcast %478 : f32 to vector<1x256xf32>
      %481 = arith.mulf %480, %479 : vector<1x256xf32>
      %482 = arith.addf %477, %481 : vector<1x256xf32>
      %c88 = arith.constant 88 : index
      %483 = memref.load %arg2[%c88] : memref<98xf32, #tpu.memory_space<smem>>
      %c0_199 = arith.constant 0 : index
      %c84_200 = arith.constant 84 : index
      %484 = vector.load %arg9[%c0_199, %c84_200] : memref<1x358xf32, #tpu.memory_space<vmem>>, vector<1x256xf32>
      %485 = vector.broadcast %483 : f32 to vector<1x256xf32>
      %486 = arith.mulf %485, %484 : vector<1x256xf32>
      %487 = arith.addf %482, %486 : vector<1x256xf32>
      %c95 = arith.constant 95 : index
      %488 = memref.load %arg2[%c95] : memref<98xf32, #tpu.memory_space<smem>>
      %c0_201 = arith.constant 0 : index
      %c100_202 = arith.constant 100 : index
      %489 = vector.load %arg9[%c0_201, %c100_202] : memref<1x358xf32, #tpu.memory_space<vmem>>, vector<1x256xf32>
      %490 = vector.broadcast %488 : f32 to vector<1x256xf32>
      %491 = arith.mulf %490, %489 : vector<1x256xf32>
      %492 = arith.addf %487, %491 : vector<1x256xf32>
      %493 = vector.extract_strided_slice %26 {offsets = [4, 0], sizes = [1, 256], strides = [1, 1]} : vector<7x256xf32> to vector<1x256xf32>
      %494 = arith.mulf %493, %492 : vector<1x256xf32>
      %495 = arith.addf %456, %494 : vector<1x256xf32>
      %cst_203 = arith.constant 0.000000e+00 : f32
      %496 = vector.broadcast %cst_203 : f32 to vector<1x256xf32>
      %c54_204 = arith.constant 54 : index
      %497 = memref.load %arg2[%c54_204] : memref<98xf32, #tpu.memory_space<smem>>
      %c0_205 = arith.constant 0 : index
      %c5_206 = arith.constant 5 : index
      %498 = vector.load %arg9[%c0_205, %c5_206] : memref<1x358xf32, #tpu.memory_space<vmem>>, vector<1x256xf32>
      %499 = vector.broadcast %497 : f32 to vector<1x256xf32>
      %500 = arith.mulf %499, %498 : vector<1x256xf32>
      %501 = arith.addf %496, %500 : vector<1x256xf32>
      %c61 = arith.constant 61 : index
      %502 = memref.load %arg2[%c61] : memref<98xf32, #tpu.memory_space<smem>>
      %c0_207 = arith.constant 0 : index
      %c21_208 = arith.constant 21 : index
      %503 = vector.load %arg9[%c0_207, %c21_208] : memref<1x358xf32, #tpu.memory_space<vmem>>, vector<1x256xf32>
      %504 = vector.broadcast %502 : f32 to vector<1x256xf32>
      %505 = arith.mulf %504, %503 : vector<1x256xf32>
      %506 = arith.addf %501, %505 : vector<1x256xf32>
      %c68_209 = arith.constant 68 : index
      %507 = memref.load %arg2[%c68_209] : memref<98xf32, #tpu.memory_space<smem>>
      %c0_210 = arith.constant 0 : index
      %c37_211 = arith.constant 37 : index
      %508 = vector.load %arg9[%c0_210, %c37_211] : memref<1x358xf32, #tpu.memory_space<vmem>>, vector<1x256xf32>
      %509 = vector.broadcast %507 : f32 to vector<1x256xf32>
      %510 = arith.mulf %509, %508 : vector<1x256xf32>
      %511 = arith.addf %506, %510 : vector<1x256xf32>
      %c75 = arith.constant 75 : index
      %512 = memref.load %arg2[%c75] : memref<98xf32, #tpu.memory_space<smem>>
      %c0_212 = arith.constant 0 : index
      %c53_213 = arith.constant 53 : index
      %513 = vector.load %arg9[%c0_212, %c53_213] : memref<1x358xf32, #tpu.memory_space<vmem>>, vector<1x256xf32>
      %514 = vector.broadcast %512 : f32 to vector<1x256xf32>
      %515 = arith.mulf %514, %513 : vector<1x256xf32>
      %516 = arith.addf %511, %515 : vector<1x256xf32>
      %c82_214 = arith.constant 82 : index
      %517 = memref.load %arg2[%c82_214] : memref<98xf32, #tpu.memory_space<smem>>
      %c0_215 = arith.constant 0 : index
      %c69_216 = arith.constant 69 : index
      %518 = vector.load %arg9[%c0_215, %c69_216] : memref<1x358xf32, #tpu.memory_space<vmem>>, vector<1x256xf32>
      %519 = vector.broadcast %517 : f32 to vector<1x256xf32>
      %520 = arith.mulf %519, %518 : vector<1x256xf32>
      %521 = arith.addf %516, %520 : vector<1x256xf32>
      %c89 = arith.constant 89 : index
      %522 = memref.load %arg2[%c89] : memref<98xf32, #tpu.memory_space<smem>>
      %c0_217 = arith.constant 0 : index
      %c85_218 = arith.constant 85 : index
      %523 = vector.load %arg9[%c0_217, %c85_218] : memref<1x358xf32, #tpu.memory_space<vmem>>, vector<1x256xf32>
      %524 = vector.broadcast %522 : f32 to vector<1x256xf32>
      %525 = arith.mulf %524, %523 : vector<1x256xf32>
      %526 = arith.addf %521, %525 : vector<1x256xf32>
      %c96_219 = arith.constant 96 : index
      %527 = memref.load %arg2[%c96_219] : memref<98xf32, #tpu.memory_space<smem>>
      %c0_220 = arith.constant 0 : index
      %c101_221 = arith.constant 101 : index
      %528 = vector.load %arg9[%c0_220, %c101_221] : memref<1x358xf32, #tpu.memory_space<vmem>>, vector<1x256xf32>
      %529 = vector.broadcast %527 : f32 to vector<1x256xf32>
      %530 = arith.mulf %529, %528 : vector<1x256xf32>
      %531 = arith.addf %526, %530 : vector<1x256xf32>
      %532 = vector.extract_strided_slice %26 {offsets = [5, 0], sizes = [1, 256], strides = [1, 1]} : vector<7x256xf32> to vector<1x256xf32>
      %533 = arith.mulf %532, %531 : vector<1x256xf32>
      %534 = arith.addf %495, %533 : vector<1x256xf32>
      %cst_222 = arith.constant 0.000000e+00 : f32
      %535 = vector.broadcast %cst_222 : f32 to vector<1x256xf32>
      %c55 = arith.constant 55 : index
      %536 = memref.load %arg2[%c55] : memref<98xf32, #tpu.memory_space<smem>>
      %c0_223 = arith.constant 0 : index
      %c6_224 = arith.constant 6 : index
      %537 = vector.load %arg9[%c0_223, %c6_224] : memref<1x358xf32, #tpu.memory_space<vmem>>, vector<1x256xf32>
      %538 = vector.broadcast %536 : f32 to vector<1x256xf32>
      %539 = arith.mulf %538, %537 : vector<1x256xf32>
      %540 = arith.addf %535, %539 : vector<1x256xf32>
      %c62 = arith.constant 62 : index
      %541 = memref.load %arg2[%c62] : memref<98xf32, #tpu.memory_space<smem>>
      %c0_225 = arith.constant 0 : index
      %c22_226 = arith.constant 22 : index
      %542 = vector.load %arg9[%c0_225, %c22_226] : memref<1x358xf32, #tpu.memory_space<vmem>>, vector<1x256xf32>
      %543 = vector.broadcast %541 : f32 to vector<1x256xf32>
      %544 = arith.mulf %543, %542 : vector<1x256xf32>
      %545 = arith.addf %540, %544 : vector<1x256xf32>
      %c69_227 = arith.constant 69 : index
      %546 = memref.load %arg2[%c69_227] : memref<98xf32, #tpu.memory_space<smem>>
      %c0_228 = arith.constant 0 : index
      %c38_229 = arith.constant 38 : index
      %547 = vector.load %arg9[%c0_228, %c38_229] : memref<1x358xf32, #tpu.memory_space<vmem>>, vector<1x256xf32>
      %548 = vector.broadcast %546 : f32 to vector<1x256xf32>
      %549 = arith.mulf %548, %547 : vector<1x256xf32>
      %550 = arith.addf %545, %549 : vector<1x256xf32>
      %c76 = arith.constant 76 : index
      %551 = memref.load %arg2[%c76] : memref<98xf32, #tpu.memory_space<smem>>
      %c0_230 = arith.constant 0 : index
      %c54_231 = arith.constant 54 : index
      %552 = vector.load %arg9[%c0_230, %c54_231] : memref<1x358xf32, #tpu.memory_space<vmem>>, vector<1x256xf32>
      %553 = vector.broadcast %551 : f32 to vector<1x256xf32>
      %554 = arith.mulf %553, %552 : vector<1x256xf32>
      %555 = arith.addf %550, %554 : vector<1x256xf32>
      %c83_232 = arith.constant 83 : index
      %556 = memref.load %arg2[%c83_232] : memref<98xf32, #tpu.memory_space<smem>>
      %c0_233 = arith.constant 0 : index
      %c70_234 = arith.constant 70 : index
      %557 = vector.load %arg9[%c0_233, %c70_234] : memref<1x358xf32, #tpu.memory_space<vmem>>, vector<1x256xf32>
      %558 = vector.broadcast %556 : f32 to vector<1x256xf32>
      %559 = arith.mulf %558, %557 : vector<1x256xf32>
      %560 = arith.addf %555, %559 : vector<1x256xf32>
      %c90 = arith.constant 90 : index
      %561 = memref.load %arg2[%c90] : memref<98xf32, #tpu.memory_space<smem>>
      %c0_235 = arith.constant 0 : index
      %c86_236 = arith.constant 86 : index
      %562 = vector.load %arg9[%c0_235, %c86_236] : memref<1x358xf32, #tpu.memory_space<vmem>>, vector<1x256xf32>
      %563 = vector.broadcast %561 : f32 to vector<1x256xf32>
      %564 = arith.mulf %563, %562 : vector<1x256xf32>
      %565 = arith.addf %560, %564 : vector<1x256xf32>
      %c97_237 = arith.constant 97 : index
      %566 = memref.load %arg2[%c97_237] : memref<98xf32, #tpu.memory_space<smem>>
      %c0_238 = arith.constant 0 : index
      %c102_239 = arith.constant 102 : index
      %567 = vector.load %arg9[%c0_238, %c102_239] : memref<1x358xf32, #tpu.memory_space<vmem>>, vector<1x256xf32>
      %568 = vector.broadcast %566 : f32 to vector<1x256xf32>
      %569 = arith.mulf %568, %567 : vector<1x256xf32>
      %570 = arith.addf %565, %569 : vector<1x256xf32>
      %571 = vector.extract_strided_slice %26 {offsets = [6, 0], sizes = [1, 256], strides = [1, 1]} : vector<7x256xf32> to vector<1x256xf32>
      %572 = arith.mulf %571, %570 : vector<1x256xf32>
      %573 = arith.addf %534, %572 : vector<1x256xf32>
      %574 = arith.negf %573 : vector<1x256xf32>
      %575 = math.exp %574 : vector<1x256xf32>
      %cst_240 = arith.constant 1.000000e+00 : f32
      %576 = vector.broadcast %cst_240 : f32 to vector<1x256xf32>
      %577 = arith.addf %576, %575 : vector<1x256xf32>
      %578 = arith.divf %576, %577 : vector<1x256xf32>
      %c0_241 = arith.constant 0 : index
      %c0_242 = arith.constant 0 : index
      %c0_243 = arith.constant 0 : index
      %579 = vector.load %arg5[%c0_241, %c0_242, %c0_243] : memref<1x1x256xf32, #tpu.memory_space<vmem>>, vector<1x1x256xf32>
      %580 = vector.shape_cast %579 : vector<1x1x256xf32> to vector<1x256xf32>
      %581 = vector.shape_cast %578 : vector<1x256xf32> to vector<1x1x256xf32>
      tpu.vector_store %arg5[%c0_241, %c0_242, %c0_243], %581 {strides = array<i32>} : memref<1x1x256xf32, #tpu.memory_space<vmem>>, vector<1x1x256xf32>,
    } else {
    }
    return
  }
  func.func @transform_0(%arg0: i32, %arg1: i32) -> i32 {
    %c0_i32 = arith.constant 0 : i32
    %c0_i32_0 = arith.constant 0 : i32
    return %c0_i32 : i32
  }
  func.func @transform_1(%arg0: i32, %arg1: i32) -> (i32, i32) {
    %c0_i32 = arith.constant 0 : i32
    %c0_i32_0 = arith.constant 0 : i32
    %c0_i32_1 = arith.constant 0 : i32
    return %c0_i32, %c0_i32_0 : i32, i32
  }
  func.func @transform_2(%arg0: i32, %arg1: i32) -> (i32, i32, i32) {
    %c0_i32 = arith.constant 0 : i32
    %c0_i32_0 = arith.constant 0 : i32
    return %arg0, %arg1, %c0_i32 : i32, i32, i32
  }
  func.func @transform_3(%arg0: i32, %arg1: i32) -> (i32, i32, i32) {
    %c0_i32 = arith.constant 0 : i32
    %c0_i32_0 = arith.constant 0 : i32
    %c0_i32_1 = arith.constant 0 : i32
    return %arg0, %c0_i32, %c0_i32_0 : i32, i32, i32
  }
}

</mosaic_0001>

<bundles_post_ra>
// kernel: spatial_attention.1
= control target key start
LH: loop header
LB: loop body
LE: loop exit
PB: predicated region body
PF: predicated region fallthrough
CT: control target
= control target key end

     0   :  { %8 = vsyncpa [#allocation7], 0  ;;  %s1911_s12 = smov 0   ;;  %s1913_s13 = smov 0   ;;  %s2670_s0 = inlined_call_operand.vmem [shape: f32[98], index: 0, kind: input, shape index: {}]   ;;  %s2671_s1 = inlined_call_operand.vmem [shape: f32[7,256], index: 1, kind: input, shape index: {}]   ;;  %s2672_s2 = inlined_call_operand.vmem [shape: f32[2,4,256], index: 2, kind: input, shape index: {}]   ;;  %s2673_s3 = inlined_call_operand.vmem [shape: f32[2,1,256], index: 3, kind: output, shape index: {}]  }
   0x1   :  { %s1915_s14 = smov 0  }
   0x2 LB: > { %s1660_s15 = sadd.s32 4294967295, %s1873_s14   ;;  %s26_s16 = sadd.s32 1, %s1869_s13  ;;  %s1873_s14 = sphi %s1915_s14, %s14_s14   ;;  %s1869_s13 = sphi %s1913_s13, %s2685_s13   ;;  %s1865_s12 = sphi %s1911_s12, %s2684_s12  }
   0x3   : > { %p28_p0 = scmp.ge.s32.totalorder %s26_s16, 2  ;;  %p1662_p1 = scmp.ge.s32.totalorder %s1873_s14, 1 }
   0x4   : > { %p127_p2 = scmp.lt.s32.totalorder %s1873_s14, 3  ;;  %p1780_p4 = scmp.eq.s32.totalorder %s1660_s15, 0 }
   0x5   : > { %s2687_s16 = smov (%p28_p0, %s26_s16), 0  ;;  %s139_s19 = sshll.u32 %s2670_s0, 4  ;;  %s140_s19 = int_to_ptr.vmem [resolvable:$true] %s139_s19 }
   0x6   : > { %p128_p3 = pnand %p1662_p1, %p127_p2  ;;  %s1875_s20 = smov [#allocation6]  }
   0x8   : > { %p1776_p5 = pneg %p128_p3  ;;  %167 = sbr.rel (%p128_p3) target bundleno = 689 (0x2b1), region = 32 }
   0xa   : > { %p1777_p6 = pnand %p1780_p4, %p1776_p5 }
   0xc   : > { %1779 = dma.vmem_to_smem (!%p1777_p6), %s140_s19, 16, %s1875_s20, [#allocation7]  }
   0xd   : > { %1860 = dma.done.wait (%p1780_p4), [#allocation7], 16  }
   0xe   : > { %1862 = vsyncadd (%p1780_p4), [#allocation7], 4294967280 }
   0xf   : > { %174 = sfence }
  0x10   : > { %p196_p7 = scmp.lt.s32.totalorder %s1865_s12, 1  ;;  %v213_v0 = vlaneseq  ;;  %v1876_v2 = vmov 0.0   ;;  %vm227_vm1 = vcmask 1043456   ;;  %v1877_v4 = vmov -inf   ;;  %s1878_s25 = smov 51  }
  0x11   : > { %vm245_vm8 = vcmask 1040384   ;;  %s1674_s26 = sld [smem:[#allocation6 + $0x23]]  ;;  %vm299_vm9 = vcmask 416768   ;;  %s1879_s5 = smov 48   ;;  %vm328_vm10 = vcmask 916480   ;;  %vm339_vm11 = vcmask 785408  }
  0x12   : > { %s2689_s12 = smov (!%p196_p7, %s1865_s12), 1  ;;  %vm1935_vm0 = vcmp.lt.s32.totalorder %v213_v0, 256  ;;  %vm1949_vm2 = vcmp.lt.s32.totalorder %v213_v0, 51  ;;  %vm1953_vm3 = vcmp.ge.s32.totalorder %v213_v0, 51  ;;  %vm1957_vm4 = vcmp.lt.s32.totalorder %v213_v0, 102  ;;  %s1672_s27 = sld [smem:[#allocation6 + $0x15]] }
  0x13   : > { %217 = vst.msk [vmem:[#allocation2] sm:$0x3] %vm1935_vm0, %v1876_v2  ;;  %s1771_s21 = sshll.u32 %s2689_s12, 3  ;;  %vm289_vm5 = vmand %vm1953_vm3, %vm1957_vm4  ;;  %vm1967_vm6 = vcmp.lt.s32.totalorder %v213_v0, 307  ;;  %s1670_s28 = sld [smem:[#allocation6 + $0x7]]  ;;  %vm350_vm12 = vcmask 654336  }
  0x14   : > { %s204_s24 = scalar_lea.vmem %s2672_s2, %s1771_s21  ;;  %218 = vst.msk [vmem:[#allocation3] sm:$0x3] %vm1935_vm0, %v1877_v4  ;;  %vm303_vm7 = vmand %vm1953_vm3, %vm1967_vm6  ;;  %s1678_s29 = sld [smem:[#allocation6 + $0xf]]  ;;  %vm361_vm13 = vcmask 523264   ;;  %vm372_vm14 = vcmask 392192   ;;  %vm383_vm15 = vcmask 261120  }
  0x15   : > { %v219_v3 = vld [vmem:[%s204_s24] sm:$0xff]  ;;  %286 = vst.msk [vmem:[#allocation4] sm:$0x1] %vm1949_vm2, %v1876_v2  ;;  %s1673_s30 = sld [smem:[#allocation6 + $0x1c]]  ;;  %s1880_s6 = smov 80   ;;  %vm648_vm3 = vcmask 1022976  }
  0x16   : > { %222 = vst [vmem:[#allocation1] ss:$2 sm:$0xff] %v219_v3  ;;  %s1671_s4 = sld [smem:[#allocation6 + $0xe]]  ;;  %s1881_s7 = smov 112   ;;  %vm737_vm4 = vcmask 1014784   ;;  %vm915_vm6 = vcmask 998400  }
  0x17   : > { %290 = vst.msk [vmem:[#allocation4 + $0x2] sm:$0x1] %vm289_vm5, %v1876_v2  ;;  %v366_v55 = vstv %s1674_s26  ;;  %s1681_s8 = sld [smem:[#allocation6 + $0x24]]  ;;  %s1882_s11 = smov 96  }
  0x18   : > { %291 = vst.msk [vmem:[#allocation5] sm:$0x1] %vm1949_vm2, %v1876_v2  ;;  %v344_v56 = vstv %s1672_s27  ;;  %s1677_s9 = sld [smem:[#allocation6 + $0x8]]  ;;  %s1883_s15 = smov 64   ;;  %vm559_vm2 = vcmask 1031168  }
  0x19   : > { %292 = vst.msk [vmem:[#allocation5 + $0x2] sm:$0x1] %vm289_vm5, %v1876_v2  ;;  %v322_v57 = vstv %s1670_s28  ;;  %s1675_s10 = sld [smem:[#allocation6 + $0x2a]]  ;;  %s1884_s20 = smov 32   ;;  %vm826_vm5 = vcmask 1006592  }
  0x1a   : > { %v220_v33 = vld [vmem:[#allocation2] sm:$0x3]  ;;  %v411_v62 = vstv %s1678_s29  ;;  %s1685_s17 = sld [smem:[#allocation6 + $0x10]] }
  0x1b   : > { %v254_v45 = vld [vmem:[#allocation3] sm:$0x3]  ;;  %v355_v63 = vstv %s1673_s30  ;;  %s1680_s18 = sld [smem:[#allocation6 + $0x1d]] }
  0x1c   : > { %v333_v0 = vstv %s1671_s4  ;;  %s1679_s19 = sld [smem:[#allocation6 + $0x16]] }
  0x1d   : > { %v223_v5 = vld.sshfl [vmem:[#allocation1] sm:$0xff pattern:$0x75316420]  ;;  %v224_v6 = vld.sshfl [vmem:[#allocation1 + $0x8] sm:$0xff pattern:$0x75316420] }
  0x1e   : > { %v228_v7 = vsel %vm227_vm1, %v223_v5, 0.0  ;;  %v235_v8 = vsel %vm227_vm1, %v224_v6, 0.0  ;;  %255 = vst [vmem:[#allocation1] ss:$2 sm:$0xff] %v219_v3  ;;  %v441_v5 = vstv %s1681_s8  ;;  %v401_v6 = vstv %s1677_s9  ;;  %s1688_s21 = sld [smem:[#allocation6 + $0x25]] }
  0x1f   : > { %v229_v9 = vrot.slane %v228_v7, 4  ;;  %v236_v10 = vrot.slane %v235_v8, 4  ;;  %s1684_s22 = sld [smem:[#allocation6 + $0x9]] }
  0x20   : > { %s1682_s23 = sld [smem:[#allocation6 + $0x2b]] }
  0x21   : > { %v230_v11 = vadd.f32 %v229_v9, %v228_v7  ;;  %v237_v12 = vadd.f32 %v236_v10, %v235_v8  ;;  %v377_v7 = vstv %s1675_s10  ;;  %s1692_s24 = sld [smem:[#allocation6 + $0x11]] }
  0x22   : > { %v421_v13 = vstv %s1679_s19  ;;  %s1686_s26 = sld [smem:[#allocation6 + $0x17]] }
  0x23   : > { %v231_v16 = vrot.slane %v230_v11, 2  ;;  %v238_v17 = vrot.slane %v237_v12, 2  ;;  %s1695_s27 = sld [smem:[#allocation6 + $0x26]] }
  0x24   : > { %s1691_s28 = sld [smem:[#allocation6 + $0xa]] }
  0x25   : > { %v232_v19 = vadd.f32 %v231_v16, %v230_v11  ;;  %v239_v20 = vadd.f32 %v238_v17, %v237_v12  ;;  %v256_v21 = vld.sshfl [vmem:[#allocation1] sm:$0xff pattern:$0x75316420]  ;;  %v257_v22 = vld.sshfl [vmem:[#allocation1 + $0x8] sm:$0xff pattern:$0x75316420]  ;;  %v500_v11 = vstv %s1685_s17  ;;  %v431_v12 = vstv %s1680_s18 }
  0x26   : > { %v260_v23 = vsel %vm227_vm1, %v256_v21, -inf  ;;  %v267_v24 = vsel %vm227_vm1, %v257_v22, -inf  ;;  %v451_v21 = vstv %s1682_s23  ;;  %s1689_s29 = sld [smem:[#allocation6 + $0x2c]]  ;;  %vm470_vm1 = vcmask 1039360  }
  0x27   : > { %v233_v25 = vrot.slane %v232_v19, 1  ;;  %v240_v26 = vrot.slane %v239_v20, 1  ;;  %v261_v27 = vrot.slane %v260_v23, 4  ;;  %v268_v28 = vrot.slane %v267_v24, 4  ;;  %s1699_s30 = sld [smem:[#allocation6 + $0x12]] }
  0x28   : > { %s1694_s4 = sld [smem:[#allocation6 + $0x1f]] }
  0x29   : > { %v234_v29 = vadd.f32 %v233_v25, %v232_v19  ;;  %v241_v30 = vadd.f32 %v240_v26, %v239_v20  ;;  %v262_v31 = vmax.f32 %v260_v23, %v261_v27  ;;  %v269_v32 = vmax.f32 %v267_v24, %v268_v28  ;;  %s1693_s8 = sld [smem:[#allocation6 + $0x18]] }
  0x2a   : > { %v530_v19 = vstv %s1688_s21  ;;  %v490_v20 = vstv %s1684_s22  ;;  %v589_v25 = vstv %s1692_s24  ;;  %v510_v27 = vstv %s1686_s26  ;;  %s1702_s9 = sld [smem:[#allocation6 + $0x27]] }
  0x2b   : > { %v244_v34 = vrot.slane %v241_v30, 7  ;;  %v263_v35 = vrot.slane %v262_v31, 2  ;;  %v270_v36 = vrot.slane %v269_v32, 2  ;;  %s1698_s10 = sld [smem:[#allocation6 + $0xb]] }
  0x2c   : > { %s1696_s17 = sld [smem:[#allocation6 + $0x2d]] }
  0x2d   : > { %v246_v37 = vsel %vm245_vm8, %v234_v29, %v244_v34  ;;  %v264_v38 = vmax.f32 %v262_v31, %v263_v35  ;;  %v271_v39 = vmax.f32 %v269_v32, %v270_v36  ;;  %v619_v31 = vstv %s1695_s27  ;;  %s1706_s18 = sld [smem:[#allocation6 + $0x13]] }
  0x2e   : > { %v248_v40 = vadd.f32 %v246_v37, %v220_v33  ;;  %v579_v32 = vstv %s1691_s28  ;;  %v540_v33 = vstv %s1689_s29  ;;  %v678_v37 = vstv %s1699_s30  ;;  %s1701_s19 = sld [smem:[#allocation6 + $0x20]] }
  0x2f   : > { %v265_v41 = vrot.slane %v264_v38, 1  ;;  %v272_v42 = vrot.slane %v271_v39, 1  ;;  %s1700_s21 = sld [smem:[#allocation6 + $0x19]] }
  0x30   : > { %253 = vst.msk [vmem:[#allocation2] sm:$0x3] %vm1935_vm0, %v248_v40  ;;  %s1709_s22 = sld [smem:[#allocation6 + $0x28]] }
  0x31   : > { %v266_v43 = vmax.f32 %v264_v38, %v265_v41  ;;  %v273_v44 = vmax.f32 %v271_v39, %v272_v42  ;;  %v609_v38 = vstv %s1694_s4  ;;  %v599_v39 = vstv %s1693_s8  ;;  %s1705_s23 = sld [smem:[#allocation6 + $0xc]] }
  0x32   : > { %s1703_s24 = sld [smem:[#allocation6 + $0x2e]] }
  0x33   : > { %v276_v46 = vrot.slane %v273_v44, 7  ;;  %v668_v44 = vstv %s1698_s10  ;;  %s1708_s26 = sld [smem:[#allocation6 + $0x21]] }
  0x34   : > { %s1707_s27 = sld [smem:[#allocation6 + $0x1a]] }
  0x35   : > { %v277_v47 = vsel %vm245_vm8, %v266_v43, %v276_v46  ;;  %v708_v43 = vstv %s1702_s9  ;;  %s1716_s28 = sld [smem:[#allocation6 + $0x29]] }
  0x36   : > { %v279_v48 = vmax.f32 %v254_v45, %v277_v47  ;;  %v629_v45 = vstv %s1696_s17  ;;  %v797_v14 = vstv %s1709_s22  ;;  %s1712_s29 = sld [smem:[#allocation6 + $0xd]] }
  0x37   : > { %v293_v49 = vld [vmem:[#allocation2] sm:$0x3]  ;;  %v757_v18 = vstv %s1705_s23  ;;  %s1710_s30 = sld [smem:[#allocation6 + $0x2f]] }
  0x38   : > { %v294_v50 = vmul.f32 0.25, %v293_v49  ;;  %280 = vst.msk [vmem:[#allocation3] sm:$0x3] %vm1935_vm0, %v279_v48  ;;  %s1720_s4 = sld [smem:[#allocation6 + $0x3f]] }
  0x39   : > { %s1715_s8 = sld [smem:[#allocation6 + $0x22]] }
  0x3a   : > { %296 = vrot.lane.b32.xlu0 %v294_v50, %s1878_s25  ;;  %s1714_s9 = sld [smem:[#allocation6 + $0x1b]] }
  0x3b   : > { %s1676_s10 = sld [smem:[#allocation6 + $0x1]] }
  0x3c   : > { %s1723_s17 = sld [smem:[#allocation6 + $0x54]] }
  0x3d   : > { %s1722_s22 = sld [smem:[#allocation6 + $0x4d]] }
  0x3e   : > { %s1721_s23 = sld [smem:[#allocation6 + $0x46]] }
  0x3f   : > { %v305_v51 = vld [vmem:[#allocation3] sm:$0x3] }
  0x42   : > { %307 = vrot.lane.b32.xlu0 %v305_v51, %s1878_s25  ;;  %s1687_s25 = sld [smem:[#allocation6 + $0x1e]] }
  0x48   : > { %v520_v26 = vstv %s1687_s25  ;;  %s1713_s25 = sld [smem:[#allocation6 + $0x14]] }
  0xac   : > { %v297_v52 = vpop.permute.xlu0 %296 }
  0xad   : > { %v298_v53 = vrot.slane %v297_v52, 7 }
  0xaf   : > { %v300_v54 = vsel %vm299_vm9, %v298_v53, %v297_v52  ;;  %v767_v52 = vstv %s1706_s18  ;;  %v698_v53 = vstv %s1701_s19  ;;  %s1719_s18 = sld [smem:[#allocation6 + $0x38]] }
  0xb0   : > { %304 = vst.msk [vmem:[#allocation4] sm:$0x7] %vm303_vm7, %v300_v54  ;;  %v688_v54 = vstv %s1700_s21  ;;  %s1717_s19 = sld [smem:[#allocation6 + $0x30]] }
  0xb1   : > { %s1727_s21 = sld [smem:[#allocation6 + $0x40]] }
  0xb4   : > { %v308_v46 = vpop.permute.xlu0 %307 }
  0xb5   : > { %v309_v49 = vrot.slane %v308_v46, 7 }
  0xb7   : > { %v1991_v58 = vld [vmem:[#allocation4] sm:$0x7]  ;;  %v310_v51 = vsel %vm299_vm9, %v309_v49, %v308_v46 }
  0xb8   : > { %v367_v59 = vmul.f32 %v366_v55, %v1991_v58  ;;  %v345_v60 = vmul.f32 %v344_v56, %v1991_v58  ;;  %v323_v61 = vmul.f32 %v322_v57, %v1991_v58  ;;  %v412_v2 = vmul.f32 %v411_v62, %v1991_v58  ;;  %312 = vst.msk [vmem:[#allocation5] sm:$0x7] %vm303_vm7, %v310_v51  ;;  %v316_v46 = vld [vmem:[#allocation4] sm:$0x3] }
  0xb9   : > { %v356_v3 = vmul.f32 %v355_v63, %v1991_v58  ;;  %v334_v4 = vmul.f32 %v333_v0, %v1991_v58  ;;  %v442_v8 = vmul.f32 %v441_v5, %v1991_v58  ;;  %v402_v9 = vmul.f32 %v401_v6, %v1991_v58 }
  0xba   : > { %369 = vrot.lane.b32.xlu0 %v367_v59, %s1879_s5  ;;  %347 = vrot.lane.b32.xlu2 %v345_v60, %s1880_s6  ;;  %v378_v10 = vmul.f32 %v377_v7, %v1991_v58  ;;  %v501_v15 = vmul.f32 %v500_v11, %v1991_v58  ;;  %v432_v16 = vmul.f32 %v431_v12, %v1991_v58  ;;  %v718_v59 = vstv %s1703_s24  ;;  %s315_s24 = sld [smem:[#allocation6]] }
  0xbb   : > { %325 = vrot.lane.b32.xlu1 %v323_v61, %s1881_s7  ;;  %v422_v17 = vmul.f32 %v421_v13, %v1991_v58  ;;  %v531_v22 = vmul.f32 %v530_v19, %v1991_v58  ;;  %v491_v23 = vmul.f32 %v490_v20, %v1991_v58  ;;  %v452_v24 = vmul.f32 %v451_v21, %v1991_v58 }
  0xbc   : > { %v590_v28 = vmul.f32 %v589_v25, %v1991_v58  ;;  %v521_v29 = vmul.f32 %v520_v26, %v1991_v58  ;;  %v511_v30 = vmul.f32 %v510_v27, %v1991_v58  ;;  %v620_v34 = vmul.f32 %v619_v31, %v1991_v58 }
  0xbd   : > { %v580_v35 = vmul.f32 %v579_v32, %v1991_v58  ;;  %v541_v36 = vmul.f32 %v540_v33, %v1991_v58  ;;  %v679_v40 = vmul.f32 %v678_v37, %v1991_v58  ;;  %v610_v41 = vmul.f32 %v609_v38, %v1991_v58 }
  0xbe   : > { %v600_v42 = vmul.f32 %v599_v39, %v1991_v58  ;;  %v709_v47 = vmul.f32 %v708_v43, %v1991_v58  ;;  %v669_v48 = vmul.f32 %v668_v44, %v1991_v58  ;;  %v630_v50 = vmul.f32 %v629_v45, %v1991_v58 }
  0xbf   : > { %v768_v55 = vmul.f32 %v767_v52, %v1991_v58  ;;  %v699_v56 = vmul.f32 %v698_v53, %v1991_v58  ;;  %v689_v57 = vmul.f32 %v688_v54, %v1991_v58  ;;  %v798_v60 = vmul.f32 %v797_v14, %v1991_v58  ;;  %v2078_v13 = vld [vmem:[#allocation5] sm:$0x7] }
  0xc0   : > { %v758_v61 = vmul.f32 %v757_v18, %v1991_v58  ;;  %v719_v62 = vmul.f32 %v718_v59, %v1991_v58  ;;  %v856_v63 = vstv %s1713_s25  ;;  %v787_v0 = vstv %s1708_s26  ;;  %s2099_s25 = sld [smem:[#allocation6 + $0x55]] }
  0xc1   : > { %v886_v7 = vstv %s1716_s28  ;;  %v866_v19 = vstv %s1714_s9  ;;  %v937_v25 = vstv %s1719_s18  ;;  %v1020_v38 = vstv %s1727_s21  ;;  %s2101_s26 = sld [smem:[#allocation6 + $0x39]] }
  0xc2   : > { %414 = vrot.lane.b32.xlu0 %v412_v2, %s1882_s11  ;;  %358 = vrot.lane.b32.xlu2 %v356_v3, %s1883_s15  ;;  %v777_v2 = vstv %s1707_s27  ;;  %v857_v3 = vmul.f32 %v856_v63, %v1991_v58  ;;  %v938_v31 = vmul.f32 %v937_v25, %v2078_v13  ;;  %v967_v39 = vstv %s1722_s22  ;;  %s2103_s27 = sld [smem:[#allocation6 + $0x5b]] }
  0xc3   : > { %336 = vrot.lane.b32.xlu1 %v334_v4, %s1882_s11  ;;  %v788_v4 = vmul.f32 %v787_v0, %v1991_v58  ;;  %v778_v5 = vmul.f32 %v777_v2, %v1991_v58  ;;  %v968_v43 = vmul.f32 %v967_v39, %v2078_v13  ;;  %v317_v45 = vstv %s315_s24  ;;  %s2113_s28 = sld [smem:[#allocation6 + $0x3a]] }
  0xc4   : > { %v318_v51 = vmul.f32 %v317_v45, %v316_v46  ;;  %s2143_s9 = sld [smem:[#allocation6 + $0x3b]] }
  0xc5   : > { %s2167_s18 = sld [smem:[#allocation6 + $0x3c]] }
  0xc6   : > { %s1754_s21 = sld [smem:[#allocation6 + $0x3d]] }
  0xc7   : > { %v1010_v54 = vstv %s2101_s26  ;;  %s1748_s22 = sld [smem:[#allocation6 + $0x43]] }
  0xc8   : > { %v1011_v63 = vmul.f32 %v1010_v54, %v2078_v13  ;;  %s2200_s24 = sld [smem:[#allocation6 + $0x4a]] }
  0xc9   : > { %s1742_s26 = sld [smem:[#allocation6 + $0x49]] }
  0xca   : > { %444 = vrot.lane.b32.xlu0 %v442_v8, %s1879_s5  ;;  %404 = vrot.lane.b32.xlu2 %v402_v9, %s1881_s7  ;;  %v846_v8 = vstv %s1712_s29  ;;  %v807_v9 = vstv %s1710_s30  ;;  %s2116_s29 = sld [smem:[#allocation6 + $0x4e]] }
  0xcb   : > { %380 = vrot.lane.b32.xlu1 %v378_v10, %s1884_s20  ;;  %v887_v10 = vmul.f32 %v886_v7, %v1991_v58  ;;  %v847_v11 = vmul.f32 %v846_v8, %v1991_v58  ;;  %v808_v12 = vmul.f32 %v807_v9, %v1991_v58  ;;  %s2120_s30 = sld [smem:[#allocation6 + $0x47]] }
  0xd2   : > { %503 = vrot.lane.b32.xlu0 %v501_v15, %s1882_s11  ;;  %434 = vrot.lane.b32.xlu2 %v432_v16, %s1883_s15  ;;  %v947_v15 = vstv %s1720_s4  ;;  %s2127_s4 = sld [smem:[#allocation6 + $0x2]] }
  0xd3   : > { %424 = vrot.lane.b32.xlu1 %v422_v17, %s1880_s6  ;;  %v876_v17 = vstv %s1715_s8  ;;  %v948_v20 = vmul.f32 %v947_v15, %v2078_v13  ;;  %s2139_s8 = sld [smem:[#allocation6 + $0x48]] }
  0xd4   : > { %v877_v21 = vmul.f32 %v876_v17, %v1991_v58 }
  0xda   : > { %533 = vrot.lane.b32.xlu0 %v531_v22, %s1879_s5  ;;  %493 = vrot.lane.b32.xlu2 %v491_v23, %s1881_s7  ;;  %v867_v22 = vmul.f32 %v866_v19, %v1991_v58  ;;  %v397_v23 = vstv %s1676_s10  ;;  %v1030_v19 = vstv %s2120_s30  ;;  %s2147_s10 = sld [smem:[#allocation6 + $0x5c]] }
  0xdb   : > { %454 = vrot.lane.b32.xlu1 %v452_v24, %s1884_s20  ;;  %v977_v24 = vstv %s1723_s17  ;;  %s2164_s17 = sld [smem:[#allocation6 + $0x4f]] }
  0xdc   : > { %s1756_s30 = sld [smem:[#allocation6 + $0x4b]] }
  0xe0   : > { %v1060_v39 = vstv %s2147_s10  ;;  %s1745_s10 = sld [smem:[#allocation6 + $0x5e]] }
  0xe2   : > { %592 = vrot.lane.b32.xlu0 %v590_v28, %s1882_s11  ;;  %523 = vrot.lane.b32.xlu2 %v521_v29, %s1883_s15  ;;  %v398_v28 = vmul.f32 %v397_v23, %v1991_v58  ;;  %v896_v29 = vstv %s1717_s19  ;;  %s1734_s19 = sld [smem:[#allocation6 + $0x41]] }
  0xe3   : > { %513 = vrot.lane.b32.xlu1 %v511_v30, %s1880_s6  ;;  %v978_v30 = vmul.f32 %v977_v24, %v2078_v13  ;;  %v486_v24 = vstv %s2127_s4  ;;  %s1750_s4 = sld [smem:[#allocation6 + $0x51]] }
  0xea   : > { %622 = vrot.lane.b32.xlu0 %v620_v34, %s1879_s5  ;;  %582 = vrot.lane.b32.xlu2 %v580_v35, %s1881_s7  ;;  %v897_v34 = vmul.f32 %v896_v29, %v1991_v58 }
  0xeb   : > { %543 = vrot.lane.b32.xlu1 %v541_v36, %s1884_s20 }
  0xf2   : > { %681 = vrot.lane.b32.xlu0 %v679_v40, %s1882_s11  ;;  %612 = vrot.lane.b32.xlu2 %v610_v41, %s1883_s15  ;;  %v957_v40 = vstv %s1721_s23  ;;  %s1741_s23 = sld [smem:[#allocation6 + $0x42]] }
  0xf3   : > { %602 = vrot.lane.b32.xlu1 %v600_v42, %s1880_s6  ;;  %v1021_v42 = vmul.f32 %v1020_v38, %v2078_v13  ;;  %v958_v44 = vmul.f32 %v957_v40, %v2078_v13 }
  0xfa   : > { %711 = vrot.lane.b32.xlu0 %v709_v47, %s1879_s5  ;;  %671 = vrot.lane.b32.xlu2 %v669_v48, %s1881_s7 }
  0xfb   : > { %632 = vrot.lane.b32.xlu1 %v630_v50, %s1884_s20  ;;  %v1050_v50 = vstv %s2099_s25  ;;  %s1743_s25 = sld [smem:[#allocation6 + $0x50]] }
  0xfc   : > { %v1051_v59 = vmul.f32 %v1050_v50, %v2078_v13 }
 0x102   : > { %770 = vrot.lane.b32.xlu0 %v768_v55, %s1882_s11  ;;  %701 = vrot.lane.b32.xlu2 %v699_v56, %s1883_s15 }
 0x103   : > { %691 = vrot.lane.b32.xlu1 %v689_v57, %s1880_s6  ;;  %v987_v57 = vstv %s2103_s27  ;;  %s1738_s27 = sld [smem:[#allocation6 + $0x5d]] }
 0x104   : > { %v988_v2 = vmul.f32 %v987_v57, %v2078_v13 }
 0x10a   : > { %800 = vrot.lane.b32.xlu0 %v798_v60, %s1879_s5  ;;  %760 = vrot.lane.b32.xlu2 %v758_v61, %s1881_s7 }
 0x10b   : > { %721 = vrot.lane.b32.xlu1 %v719_v62, %s1884_s20 }
 0x112   : > { %859 = vrot.lane.b32.xlu0 %v857_v3, %s1882_s11  ;;  %790 = vrot.lane.b32.xlu2 %v788_v4, %s1883_s15 }
 0x113   : > { %780 = vrot.lane.b32.xlu1 %v778_v5, %s1880_s6 }
 0x114   : > { %v2071_v6 = vpop.permute.xlu2 %347 }
 0x115   : > { %v349_v55 = vrot.slane %v2071_v6, 1 }
 0x117   : > { %v351_v3 = vsel %vm350_vm12, %v2071_v6, %v349_v55  ;;  %v1128_v55 = vstv %s2164_s17  ;;  %s1744_s17 = sld [smem:[#allocation6 + $0x57]] }
 0x118   : > { %v1129_v57 = vmul.f32 %v1128_v55, %v2078_v13 }
 0x11a   : > { %889 = vrot.lane.b32.xlu0 %v887_v10, %s1879_s5  ;;  %849 = vrot.lane.b32.xlu2 %v847_v11, %s1881_s7  ;;  %v1098_v11 = vstv %s2113_s28  ;;  %s1761_s28 = sld [smem:[#allocation6 + $0x3e]] }
 0x11b   : > { %810 = vrot.lane.b32.xlu1 %v808_v12, %s1884_s20  ;;  %v1040_v12 = vstv %s2116_s29  ;;  %s1737_s29 = sld [smem:[#allocation6 + $0x56]] }
 0x11c   : > { %v2081_v16 = vpop.permute.xlu2 %358  ;;  %v1041_v23 = vmul.f32 %v1040_v12, %v2078_v13 }
 0x11d   : > { %v360_v60 = vrot.slane %v2081_v16, 1  ;;  %v1226_v55 = vstv %s1744_s17  ;;  %s1739_s17 = sld [smem:[#allocation6 + $0x34]] }
 0x11f   : > { %v362_v7 = vsel %vm361_vm13, %v2081_v16, %v360_v60 }
 0x122   : > { %879 = vrot.lane.b32.xlu2 %v877_v21, %s1883_s15  ;;  %950 = vrot.lane.b32.xlu0 %v948_v20, %s1882_s11 }
 0x123   : > { %869 = vrot.lane.b32.xlu1 %v867_v22, %s1880_s6  ;;  %v1099_v22 = vmul.f32 %v1098_v11, %v2078_v13 }
 0x124   : > { %v405_v26 = vpop.permute.xlu2 %404 }
 0x125   : > { %v406_v27 = vrot.slane %v405_v26, 1 }
 0x127   : > { %v407_v32 = vsel %vm328_vm10, %v405_v26, %v406_v27  ;;  %v1031_v26 = vmul.f32 %v1030_v19, %v2078_v13 }
 0x128   : > { %v409_v33 = vadd.f32 %v407_v32, %v398_v28  ;;  %v487_v28 = vmul.f32 %v486_v24, %v1991_v58 }
 0x12a   : > { %980 = vrot.lane.b32.xlu0 %v978_v30, %s1879_s5  ;;  %940 = vrot.lane.b32.xlu2 %v938_v31, %s1881_s7  ;;  %v1118_v31 = vstv %s2139_s8  ;;  %s1755_s8 = sld [smem:[#allocation6 + $0x44]] }
 0x12b   : > { %899 = vrot.lane.b32.xlu1 %v897_v34, %s1884_s20  ;;  %v1186_v34 = vstv %s2143_s9  ;;  %s1751_s9 = sld [smem:[#allocation6 + $0x58]] }
 0x12c   : > { %v2097_v35 = vpop.permute.xlu2 %434  ;;  %v370_v36 = vpop.permute.xlu0 %369  ;;  %v1187_v45 = vmul.f32 %v1186_v34, %v2078_v13 }
 0x12d   : > { %v326_v37 = vpop.permute.xlu1 %325  ;;  %v371_v4 = vrot.slane %v370_v36, 1 }
 0x12e   : > { %v327_v41 = vrot.slane %v326_v37, 1 }
 0x12f   : > { %v373_v15 = vsel %vm372_vm14, %v370_v36, %v371_v4  ;;  %v436_v36 = vrot.slane %v2097_v35, 1 }
 0x130   : > { %v329_v47 = vsel %vm328_vm10, %v326_v37, %v327_v41  ;;  %v1119_v41 = vmul.f32 %v1118_v31, %v2078_v13  ;;  %v1148_v31 = vstv %s1738_s27  ;;  %s2286_s27 = sld [smem:[#allocation6 + $0x4]] }
 0x131   : > { %v331_v14 = vadd.f32 %v329_v47, %v318_v51  ;;  %v1061_v47 = vmul.f32 %v1060_v39, %v2078_v13  ;;  %v1149_v34 = vmul.f32 %v1148_v31, %v2078_v13 }
 0x132   : > { %1023 = vrot.lane.b32.xlu0 %v1021_v42, %s1882_s11  ;;  %970 = vrot.lane.b32.xlu2 %v968_v43, %s1883_s15 }
 0x133   : > { %960 = vrot.lane.b32.xlu1 %v958_v44, %s1880_s6 }
 0x134   : > { %v494_v48 = vpop.permute.xlu2 %493  ;;  %v415_v49 = vpop.permute.xlu0 %414 }
 0x135   : > { %v337_v52 = vpop.permute.xlu1 %336  ;;  %v416_v53 = vrot.slane %v415_v49, 1  ;;  %v495_v16 = vrot.slane %v494_v48, 1 }
 0x136   : > { %v338_v56 = vrot.slane %v337_v52, 1 }
 0x137   : > { %v417_v18 = vsel %vm339_vm11, %v415_v49, %v416_v53  ;;  %v496_v27 = vsel %vm328_vm10, %v494_v48, %v495_v16  ;;  %v437_v48 = vsel %vm361_vm13, %v2097_v35, %v436_v36  ;;  %v1108_v35 = vstv %s1734_s19  ;;  %s1762_s19 = sld [smem:[#allocation6 + $0x45]] }
 0x138   : > { %v340_v61 = vsel %vm339_vm11, %v337_v52, %v338_v56  ;;  %v419_v62 = vadd.f32 %v417_v18, %v409_v33  ;;  %v498_v37 = vadd.f32 %v496_v27, %v487_v28  ;;  %v1274_v56 = vstv %s2167_s18  ;;  %s1763_s18 = sld [smem:[#allocation6 + $0x4c]] }
 0x139   : > { %v342_v0 = vadd.f32 %v340_v61, %v331_v14  ;;  %v1275_v14 = vmul.f32 %v1274_v56, %v2078_v13  ;;  %v1109_v18 = vmul.f32 %v1108_v35, %v2078_v13 }
 0x13a   : > { %1053 = vrot.lane.b32.xlu0 %v1051_v59, %s1879_s5  ;;  %1013 = vrot.lane.b32.xlu2 %v1011_v63, %s1881_s7  ;;  %v1284_v63 = vstv %s1748_s22  ;;  %s1764_s22 = sld [smem:[#allocation6 + $0x53]] }
 0x13b   : > { %v353_v5 = vadd.f32 %v351_v3, %v342_v0  ;;  %990 = vrot.lane.b32.xlu1 %v988_v2, %s1884_s20  ;;  %v1196_v3 = vstv %s1741_s23  ;;  %s1757_s23 = sld [smem:[#allocation6 + $0x52]] }
 0x13c   : > { %v2137_v8 = vpop.permute.xlu2 %523  ;;  %v445_v9 = vpop.permute.xlu0 %444 }
 0x13d   : > { %v381_v6 = vpop.permute.xlu1 %380  ;;  %v364_v10 = vadd.f32 %v362_v7, %v353_v5  ;;  %v446_v42 = vrot.slane %v445_v9, 1  ;;  %v525_v0 = vrot.slane %v2137_v8, 1 }
 0x13e   : > { %v382_v17 = vrot.slane %v381_v6, 1 }
 0x13f   : > { %v375_v20 = vadd.f32 %v373_v15, %v364_v10  ;;  %v447_v50 = vsel %vm372_vm14, %v445_v9, %v446_v42  ;;  %v1285_v9 = vmul.f32 %v1284_v63, %v2078_v13  ;;  %v1197_v10 = vmul.f32 %v1196_v3, %v2078_v13 }
 0x140   : > { %v384_v21 = vsel %vm383_vm15, %v381_v6, %v382_v17  ;;  %v526_v11 = vsel %vm361_vm13, %v2137_v8, %v525_v0  ;;  %v1216_v8 = vstv %s1743_s25  ;;  %v1304_v42 = vstv %s1750_s4  ;;  %s2281_s25 = sld [smem:[#allocation6 + $0x61]]  ;;  %s1888_s4 = smov 124  }
 0x141   : > { %v2153_v25 = vadd.f32 %v384_v21, %v375_v20  ;;  %v1294_v21 = vstv %s2200_s24  ;;  %v1217_v24 = vmul.f32 %v1216_v8, %v2078_v13  ;;  %v1470_v63 = vstv %s1763_s18  ;;  %s1690_s24 = sld [smem:[#allocation6 + $0x3]] }
 0x142   : > { %1101 = vrot.lane.b32.xlu0 %v1099_v22, %s1881_s7  ;;  %1043 = vrot.lane.b32.xlu2 %v1041_v23, %s1883_s15  ;;  %v1206_v22 = vstv %s1742_s26  ;;  %v1295_v23 = vmul.f32 %v1294_v21, %v2078_v13  ;;  %v1460_v0 = vstv %s1762_s19  ;;  %v1471_v3 = vmul.f32 %v1470_v63, %v2078_v13  ;;  %s2283_s26 = sld [smem:[#allocation6 + $0x59]]  ;;  %v931_v63 = vld [vmem:[#allocation5] sm:$0x3] }
 0x143   : > { %1033 = vrot.lane.b32.xlu1 %v1031_v26, %s1880_s6  ;;  %v1207_v26 = vmul.f32 %v1206_v22, %v2078_v13  ;;  %s1753_s18 = sld [smem:[#allocation6 + $0x36]] }
 0x144   : > { %v2161_v29 = vpop.permute.xlu2 %582  ;;  %v504_v30 = vpop.permute.xlu0 %503  ;;  %s1760_s19 = sld [smem:[#allocation6 + $0x37]] }
 0x145   : > { %v425_v32 = vpop.permute.xlu1 %424  ;;  %v505_v33 = vrot.slane %v504_v30, 1 }
 0x146   : > { %v426_v38 = vrot.slane %v425_v32, 1 }
 0x147   : > { %v506_v40 = vsel %vm339_vm11, %v504_v30, %v505_v33  ;;  %v1138_v33 = vstv %s1737_s29  ;;  %v575_v22 = vstv %s1690_s24  ;;  %s1886_s29 = smov 126  }
 0x148   : > { %v427_v43 = vsel %vm350_vm12, %v425_v32, %v426_v38  ;;  %v508_v44 = vadd.f32 %v506_v40, %v498_v37  ;;  %v1450_v32 = vstv %s1761_s28  ;;  %v1139_v37 = vmul.f32 %v1138_v33, %v2078_v13  ;;  %s1885_s28 = smov 127  }
 0x149   : > { %v429_v46 = vadd.f32 %v427_v43, %v419_v62  ;;  %v1362_v62 = vstv %s1754_s21  ;;  %v1451_v36 = vmul.f32 %v1450_v32, %v2078_v13  ;;  %v1372_v43 = vstv %s1755_s8  ;;  %s1759_s21 = sld [smem:[#allocation6 + $0x60]]  ;;  %s1889_s8 = smov 123  }
 0x14a   : > { %1121 = vrot.lane.b32.xlu0 %v1119_v41, %s1880_s6  ;;  %1189 = vrot.lane.b32.xlu2 %v1187_v45, %s1881_s7  ;;  %v1363_v7 = vmul.f32 %v1362_v62, %v2078_v13  ;;  %v1382_v41 = vstv %s1756_s30  ;;  %v1305_v45 = vmul.f32 %v1304_v42, %v2078_v13  ;;  %v1500_v42 = vstv %s2281_s25  ;;  %s2423_s30 = sld [smem:[#allocation6 + $0x32]]  ;;  %s1669_s25 = sshll.u32 %s2689_s12, 1 }
 0x14b   : > { %v439_v49 = vadd.f32 %v437_v48, %v429_v46  ;;  %1063 = vrot.lane.b32.xlu1 %v1061_v47, %s1884_s20  ;;  %v1373_v46 = vmul.f32 %v1372_v43, %v2078_v13 }
 0x14c   : > { %v2182_v51 = vpop.permute.xlu2 %612  ;;  %v534_v52 = vpop.permute.xlu0 %533 }
 0x14d   : > { %v2184_v53 = vpop.permute.xlu1 %454  ;;  %v2186_v54 = vadd.f32 %v447_v50, %v439_v49  ;;  %v535_v4 = vrot.slane %v534_v52, 1  ;;  %v1314_v50 = vstv %s1751_s9  ;;  %s1890_s9 = smov 122  }
 0x14e   : > { %v1315_v56 = vmul.f32 %v1314_v50, %v2078_v13 }
 0x14f   : > { %v536_v15 = vsel %vm372_vm14, %v534_v52, %v535_v4  ;;  %v1236_v52 = vstv %s1745_s10  ;;  %v1461_v4 = vmul.f32 %v1460_v0, %v2078_v13  ;;  %s1732_s10 = sld [smem:[#allocation6 + $0x33]] }
 0x150   : > { %v1237_v35 = vmul.f32 %v1236_v52, %v2078_v13  ;;  %v614_v52 = vrot.slane %v2182_v51, 1 }
 0x152   : > { %1131 = vrot.lane.b32.xlu0 %v1129_v57, %s1883_s15  ;;  %1277 = vrot.lane.b32.xlu2 %v1275_v14, %s1881_s7  ;;  %v1227_v57 = vmul.f32 %v1226_v55, %v2078_v13  ;;  %v1501_v55 = vmul.f32 %v1500_v42, %v2078_v13 }
 0x153   : > { %1111 = vrot.lane.b32.xlu1 %v1109_v18, %s1882_s11 }
 0x154   : > { %v2196_v59 = vpop.permute.xlu2 %671  ;;  %v2198_v60 = vpop.permute.xlu0 %592 }
 0x155   : > { %v514_v61 = vpop.permute.xlu1 %513 }
 0x156   : > { %v515_v2 = vrot.slane %v514_v61, 1 }
 0x158   : > { %v516_v5 = vsel %vm350_vm12, %v514_v61, %v515_v2 }
 0x159   : > { %v518_v6 = vadd.f32 %v516_v5, %v508_v44  ;;  %v1383_v44 = vmul.f32 %v1382_v41, %v2078_v13 }
 0x15a   : > { %1365 = vrot.lane.b32.xlu0 %v1363_v7, %s1881_s7  ;;  %1287 = vrot.lane.b32.xlu2 %v1285_v9, %s1882_s11  ;;  %v456_v9 = vrot.slane %v2184_v53, 1 }
 0x15b   : > { %v528_v12 = vadd.f32 %v526_v11, %v518_v6  ;;  %1199 = vrot.lane.b32.xlu1 %v1197_v10, %s1882_s11  ;;  %v1412_v10 = vstv %s1759_s21  ;;  %v1480_v11 = vstv %s1764_s22 }
 0x15c   : > { %v2213_v17 = vpop.permute.xlu2 %701  ;;  %v2215_v19 = vpop.permute.xlu0 %622  ;;  %v1413_v21 = vmul.f32 %v1412_v10, %v2078_v13  ;;  %v1481_v8 = vmul.f32 %v1480_v11, %v2078_v13 }
 0x15d   : > { %v2217_v16 = vpop.permute.xlu1 %543  ;;  %v2219_v20 = vadd.f32 %v536_v15, %v528_v12  ;;  %v1392_v12 = vstv %s1757_s23  ;;  %v584_v15 = vrot.slane %v2161_v29, 1 }
 0x15f   : > { %v585_v31 = vsel %vm328_vm10, %v2161_v29, %v584_v15  ;;  %v545_v29 = vrot.slane %v2217_v16, 1 }
 0x162   : > { %1297 = vrot.lane.b32.xlu0 %v1295_v23, %s1880_s6  ;;  %1219 = vrot.lane.b32.xlu2 %v1217_v24, %s1883_s15  ;;  %v457_v23 = vsel %vm383_vm15, %v2184_v53, %v456_v9  ;;  %v594_v24 = vrot.slane %v2198_v60, 1  ;;  %v576_v53 = vmul.f32 %v575_v22, %v1991_v58  ;;  %v615_v9 = vsel %vm361_vm13, %v2182_v51, %v614_v52 }
 0x163   : > { %1209 = vrot.lane.b32.xlu1 %v1207_v26, %s1880_s6  ;;  %v1393_v26 = vmul.f32 %v1392_v12, %v2078_v13  ;;  %v2304_v33 = vadd.f32 %v457_v23, %v2186_v54  ;;  %v1402_v54 = vstv %s2283_s26 }
 0x164   : > { %v2228_v27 = vpop.permute.xlu2 %760  ;;  %v2230_v28 = vpop.permute.xlu0 %681  ;;  %v587_v43 = vadd.f32 %v585_v31, %v576_v53  ;;  %v1403_v0 = vmul.f32 %v1402_v54, %v2078_v13 }
 0x165   : > { %v2232_v30 = vpop.permute.xlu1 %602 }
 0x166   : > { %v604_v32 = vrot.slane %v2232_v30, 1 }
 0x16a   : > { %1151 = vrot.lane.b32.xlu0 %v1149_v34, %s1884_s20  ;;  %1453 = vrot.lane.b32.xlu2 %v1451_v36, %s1881_s7  ;;  %s1752_s7 = sld [smem:[#allocation6 + $0x5f]] }
 0x16b   : > { %1141 = vrot.lane.b32.xlu1 %v1139_v37, %s1879_s5  ;;  %v595_v37 = vsel %vm339_vm11, %v2198_v60, %v594_v24 }
 0x16c   : > { %v2240_v38 = vpop.permute.xlu2 %790  ;;  %v2242_v39 = vpop.permute.xlu0 %711  ;;  %v597_v60 = vadd.f32 %v595_v37, %v587_v43  ;;  %v703_v43 = vrot.slane %v2213_v17, 1 }
 0x16d   : > { %v2244_v40 = vpop.permute.xlu1 %632 }
 0x170   : > { %v1324_v62 = vstv %s1752_s7  ;;  %s2500_s7 = sld [smem:[#allocation6 + $0x35]] }
 0x171   : > { %v1325_v2 = vmul.f32 %v1324_v62, %v2078_v13 }
 0x172   : > { %1385 = vrot.lane.b32.xlu0 %v1383_v44, %s1880_s6  ;;  %1307 = vrot.lane.b32.xlu2 %v1305_v45, %s1883_s15  ;;  %v664_v44 = vstv %s2286_s27  ;;  %v673_v45 = vrot.slane %v2196_v59, 1 }
 0x173   : > { %1375 = vrot.lane.b32.xlu1 %v1373_v46, %s1882_s11  ;;  %v605_v46 = vsel %vm350_vm12, %v2232_v30, %v604_v32  ;;  %v665_v30 = vmul.f32 %v664_v44, %v1991_v58 }
 0x174   : > { %v2252_v47 = vpop.permute.xlu2 %849  ;;  %v2254_v48 = vpop.permute.xlu0 %770 }
 0x175   : > { %v2256_v49 = vpop.permute.xlu1 %691 }
 0x17a   : > { %1317 = vrot.lane.b32.xlu0 %v1315_v56, %s1879_s5  ;;  %1239 = vrot.lane.b32.xlu2 %v1237_v35, %s1884_s20  ;;  %v462_v56 = vperm.slane %v2304_v33, 1  ;;  %v546_v35 = vsel %vm383_vm15, %v2217_v16, %v545_v29  ;;  %v693_v16 = vrot.slane %v2256_v49, 1  ;;  %v461_v29 = vperm.slane %v2304_v33, 0 }
 0x17b   : > { %1229 = vrot.lane.b32.xlu1 %v1227_v57, %s1879_s5  ;;  %v683_v57 = vrot.slane %v2230_v28, 1  ;;  %v2344_v10 = vadd.f32 %v546_v35, %v2219_v20  ;;  %v704_v35 = vsel %vm361_vm13, %v2213_v17, %v703_v43  ;;  %v463_v17 = vperm.slane %v2304_v33, 2 }
 0x17c   : > { %v2264_v14 = vpop.permute.xlu2 %879  ;;  %v2266_v18 = vpop.permute.xlu0 %800  ;;  %v694_v31 = vsel %vm350_vm12, %v2256_v49, %v693_v16  ;;  %v772_v49 = vrot.slane %v2254_v48, 1 }
 0x17d   : > { %v2268_v61 = vpop.permute.xlu1 %721  ;;  %v551_v42 = vperm.slane %v2344_v10, 1 }
 0x182   : > { %1327 = vrot.lane.b32.xlu0 %v1325_v2, %s1884_s20  ;;  %1473 = vrot.lane.b32.xlu2 %v1471_v3, %s1880_s6  ;;  %s2293_s6 = sld [smem:[#allocation6 + $0x31]]  ;;  %v607_v2 = vadd.f32 %v605_v46, %v597_v60  ;;  %v674_v3 = vsel %vm328_vm10, %v2196_v59, %v673_v45  ;;  %v624_v59 = vrot.slane %v2215_v19, 1 }
 0x183   : > { %1463 = vrot.lane.b32.xlu1 %v1461_v4, %s1882_s11  ;;  %s2310_s11 = sld [smem:[#allocation6 + $0x5a]]  ;;  %v676_v23 = vadd.f32 %v674_v3, %v665_v30  ;;  %v851_v3 = vrot.slane %v2252_v47, 1 }
 0x184   : > { %v941_v5 = vpop.permute.xlu2 %940  ;;  %v2276_v7 = vpop.permute.xlu0 %859  ;;  %v617_v24 = vadd.f32 %v615_v9, %v607_v2  ;;  %v625_v54 = vsel %vm372_vm14, %v2215_v19, %v624_v59  ;;  %v1830_v19 = vld [vmem:[#allocation4] sm:$0x7]  ;;  %v550_v9 = vperm.slane %v2344_v10, 0 }
 0x185   : > { %v2279_v6 = vpop.permute.xlu1 %780  ;;  %v942_v50 = vrot.slane %v941_v5, 1  ;;  %v861_v59 = vrot.slane %v2276_v7, 1 }
 0x186   : > { %v627_v45 = vadd.f32 %v625_v54, %v617_v24  ;;  %v782_v52 = vrot.slane %v2279_v6, 1  ;;  %v802_v24 = vrot.slane %v2266_v18, 1 }
 0x187   : > { %v943_v4 = vsel %vm328_vm10, %v941_v5, %v942_v50  ;;  %v634_v5 = vrot.slane %v2244_v40, 1 }
 0x188   : > { %v932_v62 = vstv %s2293_s6  ;;  %v783_v16 = vsel %vm350_vm12, %v2279_v6, %v782_v52  ;;  %v852_v6 = vsel %vm328_vm10, %v2252_v47, %v851_v3  ;;  %v1006_v3 = vstv %s2423_s30  ;;  %s208_s6 = scalar_lea.vmem %s2673_s3, %s1669_s25 }
 0x189   : > { %v933_v11 = vmul.f32 %v932_v62, %v931_v63  ;;  %v1490_v15 = vstv %s2310_s11  ;;  %v635_v44 = vsel %vm383_vm15, %v2244_v40, %v634_v5  ;;  %v773_v62 = vsel %vm339_vm11, %v2254_v48, %v772_v49 }
 0x18a   : > { %1415 = vrot.lane.b32.xlu0 %v1413_v21, %s1884_s20  ;;  %1483 = vrot.lane.b32.xlu2 %v1481_v8, %s1883_s15  ;;  %v684_v21 = vsel %vm339_vm11, %v2230_v28, %v683_v57  ;;  %v1491_v28 = vmul.f32 %v1490_v15, %v2078_v13  ;;  %v2379_v40 = vadd.f32 %v635_v44, %v627_v45  ;;  %v713_v57 = vrot.slane %v2242_v39, 1 }
 0x18b   : > { %1395 = vrot.lane.b32.xlu1 %v1393_v26, %s1883_s15  ;;  %s2318_s15 = sld [smem:[#allocation6 + $0x5]]  ;;  %v945_v20 = vadd.f32 %v943_v4, %v933_v11  ;;  %v762_v26 = vrot.slane %v2228_v27, 1  ;;  %v686_v53 = vadd.f32 %v684_v21, %v676_v23  ;;  %v792_v48 = vrot.slane %v2240_v38, 1 }
 0x18c   : > { %v2306_v34 = vpop.permute.xlu2 %970  ;;  %v2308_v36 = vpop.permute.xlu0 %889  ;;  %v640_v11 = vperm.slane %v2379_v40, 1  ;;  %v881_v49 = vrot.slane %v2264_v14, 1  ;;  %v803_v45 = vsel %vm372_vm14, %v2266_v18, %v802_v24 }
 0x18d   : > { %v2315_v41 = vpop.permute.xlu1 %810  ;;  %v696_v46 = vadd.f32 %v694_v31, %v686_v53  ;;  %v763_v50 = vsel %vm328_vm10, %v2228_v27, %v762_v26  ;;  %v723_v27 = vrot.slane %v2268_v61, 1 }
 0x18e   : > { %v812_v47 = vrot.slane %v2315_v41, 1 }
 0x18f   : > { %v706_v2 = vadd.f32 %v704_v35, %v696_v46  ;;  %v724_v15 = vsel %vm383_vm15, %v2268_v61, %v723_v27  ;;  %v882_v35 = vsel %vm361_vm13, %v2264_v14, %v881_v49 }
 0x191   : > { %v753_v51 = vstv %s2318_s15 }
 0x192   : > { %1503 = vrot.lane.b32.xlu2 %v1501_v55, %s1884_s20  ;;  %466 = vrot.lane.b32.xlu0 %v462_v56, %s1885_s28  ;;  %s2357_s20 = sld [smem:[#allocation6 + $0x6]]  ;;  %v754_v60 = vmul.f32 %v1830_v19, %v753_v51  ;;  %v793_v51 = vsel %vm361_vm13, %v2240_v38, %v792_v48  ;;  %v552_v38 = vperm.slane %v2344_v10, 2  ;;  %v641_v48 = vperm.slane %v2379_v40, 2 }
 0x193   : > { %1405 = vrot.lane.b32.xlu1 %v1403_v0, %s1879_s5 }
 0x194   : > { %v2346_v12 = vpop.permute.xlu2 %1013  ;;  %v951_v58 = vpop.permute.xlu0 %950  ;;  %v765_v0 = vadd.f32 %v763_v50, %v754_v60 }
 0x195   : > { %v2353_v8 = vpop.permute.xlu1 %869  ;;  %v952_v22 = vrot.slane %v951_v58, 1 }
 0x196   : > { %v775_v4 = vadd.f32 %v773_v62, %v765_v0  ;;  %v871_v33 = vrot.slane %v2353_v8, 1 }
 0x197   : > { %v953_v32 = vsel %vm339_vm11, %v951_v58, %v952_v22  ;;  %v714_v58 = vsel %vm372_vm14, %v2242_v39, %v713_v57 }
 0x198   : > { %v2363_v37 = vadd.f32 %v953_v32, %v945_v20  ;;  %v842_v30 = vstv %s2357_s20  ;;  %v716_v21 = vadd.f32 %v714_v58, %v706_v2  ;;  %v785_v5 = vadd.f32 %v783_v16, %v775_v4 }
 0x199   : > { %v843_v39 = vmul.f32 %v1830_v19, %v842_v30  ;;  %v862_v20 = vsel %vm339_vm11, %v2276_v7, %v861_v59  ;;  %v1015_v2 = vrot.slane %v2346_v12, 1  ;;  %v1007_v59 = vmul.f32 %v1006_v3, %v2078_v13 }
 0x19a   : > { %464 = vrot.lane.b32.xlu2 %v461_v29, %s1885_s28  ;;  %555 = vrot.lane.b32.xlu0 %v551_v42, %s1886_s29  ;;  %v2410_v22 = vadd.f32 %v724_v15, %v716_v21  ;;  %v795_v32 = vadd.f32 %v793_v51, %v785_v5  ;;  %v872_v29 = vsel %vm350_vm12, %v2353_v8, %v871_v33  ;;  %v639_v42 = vperm.slane %v2379_v40, 0 }
 0x19b   : > { %1493 = vrot.lane.b32.xlu1 %v1491_v28, %s1879_s5  ;;  %s1887_s5 = smov 125   ;;  %v854_v31 = vadd.f32 %v852_v6, %v843_v39  ;;  %v972_v28 = vrot.slane %v2306_v34, 1  ;;  %v813_v8 = vsel %vm383_vm15, %v2315_v41, %v812_v47  ;;  %v1016_v58 = vsel %vm328_vm10, %v2346_v12, %v1015_v2 }
 0x19c   : > { %v2381_v55 = vpop.permute.xlu2 %1043  ;;  %v981_v56 = vpop.permute.xlu0 %980  ;;  %v729_v44 = vperm.slane %v2410_v22, 1  ;;  %v805_v50 = vadd.f32 %v803_v45, %v795_v32  ;;  %v728_v4 = vperm.slane %v2410_v22, 0  ;;  %v1018_v40 = vadd.f32 %v1016_v58, %v1007_v59 }
 0x19d   : > { %v2389_v63 = vpop.permute.xlu1 %899  ;;  %v864_v43 = vadd.f32 %v862_v20, %v854_v31  ;;  %v982_v54 = vrot.slane %v981_v56, 1  ;;  %v973_v10 = vsel %vm361_vm13, %v2306_v34, %v972_v28  ;;  %v891_v34 = vrot.slane %v2308_v36, 1 }
 0x19e   : > { %v815_v18 = vadd.f32 %v813_v8, %v805_v50  ;;  %v901_v57 = vrot.slane %v2389_v63, 1  ;;  %v1045_v12 = vrot.slane %v2381_v55, 1 }
 0x19f   : > { %v874_v52 = vadd.f32 %v872_v29, %v864_v43  ;;  %v983_v60 = vsel %vm372_vm14, %v981_v56, %v982_v54  ;;  %v892_v14 = vsel %vm372_vm14, %v2308_v36, %v891_v34 }
 0x1a0   : > { %v817_v24 = vperm.slane %v815_v18, 0  ;;  %v1046_v31 = vsel %vm361_vm13, %v2381_v55, %v1045_v12 }
 0x1a1   : > { %v884_v0 = vadd.f32 %v882_v35, %v874_v52 }
 0x1a2   : > { %553 = vrot.lane.b32.xlu2 %v550_v9, %s1886_s29  ;;  %644 = vrot.lane.b32.xlu0 %v640_v11, %s1887_s5  ;;  %v902_v9 = vsel %vm383_vm15, %v2389_v63, %v901_v57 }
 0x1a3   : > { %468 = vrot.lane.b32.xlu1 %v463_v17, %s1885_s28  ;;  %v818_v17 = vperm.slane %v815_v18, 1  ;;  %v894_v15 = vadd.f32 %v892_v14, %v884_v0 }
 0x1a4   : > { %v2412_v61 = vpop.permute.xlu2 %1189  ;;  %v1024_v23 = vpop.permute.xlu0 %1023 }
 0x1a5   : > { %v961_v26 = vpop.permute.xlu1 %960  ;;  %v1025_v16 = vrot.slane %v1024_v23, 1  ;;  %v904_v36 = vadd.f32 %v902_v9, %v894_v15 }
 0x1a6   : > { %v962_v53 = vrot.slane %v961_v26, 1 }
 0x1a7   : > { %v1026_v63 = vsel %vm339_vm11, %v1024_v23, %v1025_v16  ;;  %v907_v20 = vperm.slane %v904_v36, 1  ;;  %v906_v55 = vperm.slane %v904_v36, 0  ;;  %v908_v50 = vperm.slane %v904_v36, 2 }
 0x1a8   : > { %v963_v7 = vsel %vm350_vm12, %v961_v26, %v962_v53  ;;  %v1028_v39 = vadd.f32 %v1026_v63, %v1018_v40  ;;  %v730_v26 = vperm.slane %v2410_v22, 2  ;;  %v1191_v36 = vrot.slane %v2412_v61, 1 }
 0x1a9   : > { %v965_v46 = vadd.f32 %v963_v7, %v2363_v37  ;;  %v819_v7 = vperm.slane %v815_v18, 2  ;;  %v1182_v40 = vstv %s1739_s17 }
 0x1aa   : > { %642 = vrot.lane.b32.xlu2 %v639_v42, %s1887_s5  ;;  %733 = vrot.lane.b32.xlu0 %v729_v44, %s1888_s4 }
 0x1ab   : > { %v975_v19 = vadd.f32 %v973_v10, %v965_v46  ;;  %557 = vrot.lane.b32.xlu1 %v552_v38, %s1886_s29 }
 0x1ac   : > { %v2441_v41 = vpop.permute.xlu2 %1277  ;;  %v1054_v37 = vpop.permute.xlu0 %1053 }
 0x1ad   : > { %v991_v62 = vpop.permute.xlu1 %990  ;;  %v985_v27 = vadd.f32 %v983_v60, %v975_v19  ;;  %v1055_v23 = vrot.slane %v1054_v37, 1  ;;  %v1094_v60 = vstv %s1732_s10 }
 0x1ae   : > { %v992_v30 = vrot.slane %v991_v62, 1  ;;  %v1095_v57 = vmul.f32 %v1094_v60, %v2078_v13 }
 0x1af   : > { %v1056_v38 = vsel %vm372_vm14, %v1054_v37, %v1055_v23 }
 0x1b0   : > { %v993_v56 = vsel %vm383_vm15, %v991_v62, %v992_v30 }
 0x1b1   : > { %v2455_v11 = vadd.f32 %v993_v56, %v985_v27 }
 0x1b2   : > { %731 = vrot.lane.b32.xlu2 %v728_v4, %s1888_s4  ;;  %822 = vrot.lane.b32.xlu0 %v818_v17, %s1889_s8 }
 0x1b3   : > { %646 = vrot.lane.b32.xlu1 %v641_v48, %s1887_s5 }
 0x1b4   : > { %v2465_v21 = vpop.permute.xlu2 %1287  ;;  %v1102_v5 = vpop.permute.xlu0 %1101 }
 0x1b5   : > { %v1034_v6 = vpop.permute.xlu1 %1033  ;;  %v1103_v18 = vrot.slane %v1102_v5, 1 }
 0x1b6   : > { %v1035_v33 = vrot.slane %v1034_v6, 1 }
 0x1b7   : > { %v1104_v34 = vsel %vm328_vm10, %v1102_v5, %v1103_v18 }
 0x1b8   : > { %v1036_v51 = vsel %vm350_vm12, %v1034_v6, %v1035_v33  ;;  %v1106_v2 = vadd.f32 %v1104_v34, %v1095_v57 }
 0x1b9   : > { %v1038_v47 = vadd.f32 %v1036_v51, %v1028_v39  ;;  %v1192_v39 = vsel %vm328_vm10, %v2412_v61, %v1191_v36  ;;  %v1270_v61 = vstv %s2500_s7 }
 0x1ba   : > { %820 = vrot.lane.b32.xlu2 %v817_v24, %s1889_s8  ;;  %911 = vrot.lane.b32.xlu0 %v907_v20, %s1890_s9  ;;  %v2509_v20 = vld [vmem:[#allocation5] sm:$0x7] }
 0x1bb   : > { %v1048_v32 = vadd.f32 %v1046_v31, %v1038_v47  ;;  %735 = vrot.lane.b32.xlu1 %v730_v26, %s1888_s4  ;;  %v1183_v47 = vmul.f32 %v2509_v20, %v1182_v40  ;;  %v1279_v26 = vrot.slane %v2441_v41, 1 }
 0x1bc   : > { %v2475_v28 = vpop.permute.xlu2 %1219  ;;  %v1122_v53 = vpop.permute.xlu0 %1121 }
 0x1bd   : > { %v1064_v29 = vpop.permute.xlu1 %1063  ;;  %v1058_v22 = vadd.f32 %v1056_v38, %v1048_v32  ;;  %v1123_v3 = vrot.slane %v1122_v53, 1 }
 0x1be   : > { %v1065_v42 = vrot.slane %v1064_v29, 1 }
 0x1bf   : > { %v1124_v56 = vsel %vm350_vm12, %v1122_v53, %v1123_v3 }
 0x1c0   : > { %v1066_v43 = vsel %vm383_vm15, %v1064_v29, %v1065_v42  ;;  %v1194_v42 = vadd.f32 %v1192_v39, %v1183_v47 }
 0x1c1   : > { %v1068_v54 = vadd.f32 %v1066_v43, %v1058_v22  ;;  %v1289_v22 = vrot.slane %v2465_v21, 1 }
 0x1c2   : > { %909 = vrot.lane.b32.xlu2 %v906_v55, %s1890_s9  ;;  %v1280_v55 = vsel %vm328_vm10, %v2441_v41, %v1279_v26 }
 0x1c3   : > { %824 = vrot.lane.b32.xlu1 %v819_v7, %s1889_s8  ;;  %v1071_v44 = vperm.slane %v1068_v54, 1  ;;  %v1070_v46 = vperm.slane %v1068_v54, 0  ;;  %v1072_v35 = vperm.slane %v1068_v54, 2 }
 0x1c4   : > { %v2481_v49 = vpop.permute.xlu2 %1453  ;;  %v1132_v45 = vpop.permute.xlu0 %1131 }
 0x1c5   : > { %v1112_v8 = vpop.permute.xlu1 %1111  ;;  %1075 = vrot.lane.b32.xlu0 %v1071_v44, %s1885_s28  ;;  %v1133_v4 = vrot.slane %v1132_v45, 1  ;;  %v1271_v44 = vmul.f32 %v2509_v20, %v1270_v61 }
 0x1c6   : > { %v1113_v37 = vrot.slane %v1112_v8, 1 }
 0x1c7   : > { %v1134_v48 = vsel %vm361_vm13, %v1132_v45, %v1133_v4  ;;  %v1221_v45 = vrot.slane %v2475_v28, 1 }
 0x1c8   : > { %v1114_v62 = vsel %vm339_vm11, %v1112_v8, %v1113_v37  ;;  %v1290_v8 = vsel %vm339_vm11, %v2465_v21, %v1289_v22 }
 0x1c9   : > { %v1116_v16 = vadd.f32 %v1114_v62, %v1106_v2 }
 0x1ca   : > { %1073 = vrot.lane.b32.xlu2 %v1070_v46, %s1885_s28 }
 0x1cb   : > { %913 = vrot.lane.b32.xlu1 %v908_v50, %s1890_s9  ;;  %v1126_v17 = vadd.f32 %v1124_v56, %v1116_v16  ;;  %v1282_v50 = vadd.f32 %v1280_v55, %v1271_v44 }
 0x1cc   : > { %v2486_v10 = vpop.permute.xlu2 %1307  ;;  %v2488_v52 = vpop.permute.xlu0 %1365 }
 0x1cd   : > { %v1200_v19 = vpop.permute.xlu1 %1199  ;;  %v1136_v59 = vadd.f32 %v1134_v48, %v1126_v17  ;;  %v1292_v37 = vadd.f32 %v1290_v8, %v1282_v50  ;;  %v1309_v57 = vrot.slane %v2486_v10, 1  ;;  %v2570_v50 = vld [vmem:[%s2671_s1] sm:$0x7f] }
 0x1ce   : > { %v1201_v6 = vrot.slane %v1200_v19, 1 }
 0x1d0   : > { %v1202_v53 = vsel %vm339_vm11, %v1200_v19, %v1201_v6 }
 0x1d1   : > { %v1204_v54 = vadd.f32 %v1202_v53, %v1194_v42  ;;  %v1446_v42 = vstv %s1760_s19 }
 0x1d3   : > { %1077 = vrot.lane.b32.xlu1 %v1072_v35, %s1885_s28  ;;  %v1222_v35 = vsel %vm361_vm13, %v2475_v28, %v1221_v45  ;;  %v1310_v28 = vsel %vm361_vm13, %v2486_v10, %v1309_v57  ;;  %v1367_v10 = vrot.slane %v2488_v52, 1 }
 0x1d4   : > { %v2494_v27 = vpop.permute.xlu2 %1239  ;;  %v1298_v0 = vpop.permute.xlu0 %1297 }
 0x1d5   : > { %v1210_v30 = vpop.permute.xlu1 %1209  ;;  %v1299_v7 = vrot.slane %v1298_v0, 1  ;;  %v1241_v41 = vrot.slane %v2494_v27, 1 }
 0x1d6   : > { %v1211_v51 = vrot.slane %v1210_v30, 1 }
 0x1d7   : > { %v1300_v18 = vsel %vm350_vm12, %v1298_v0, %v1299_v7  ;;  %v1242_v0 = vsel %vm383_vm15, %v2494_v27, %v1241_v41 }
 0x1d8   : > { %v1212_v43 = vsel %vm350_vm12, %v1210_v30, %v1211_v51  ;;  %v1302_v2 = vadd.f32 %v1300_v18, %v1292_v37 }
 0x1d9   : > { %v1214_v46 = vadd.f32 %v1212_v43, %v1204_v54  ;;  %v388_v54 = vperm.slane %v2153_v25, 0 }
 0x1da   : > { %v1312_v4 = vadd.f32 %v1310_v28, %v1302_v2 }
 0x1db   : > { %v1224_v62 = vadd.f32 %v1222_v35, %v1214_v46  ;;  %v392_v57 = vmul.f32 %v388_v54, %v2570_v50 }
 0x1dc   : > { %v2497_v14 = vpop.permute.xlu2 %1473  ;;  %v1152_v9 = vpop.permute.xlu0 %1151 }
 0x1dd   : > { %v1142_v13 = vpop.permute.xlu1 %1141  ;;  %v1153_v15 = vrot.slane %v1152_v9, 1 }
 0x1de   : > { %v1143_v58 = vrot.slane %v1142_v13, 1 }
 0x1df   : > { %v1154_v12 = vsel %vm383_vm15, %v1152_v9, %v1153_v15 }
 0x1e0   : > { %v1144_v63 = vsel %vm372_vm14, %v1142_v13, %v1143_v58 }
 0x1e1   : > { %v1146_v5 = vadd.f32 %v1144_v63, %v1136_v59 }
 0x1e3   : > { %v1156_v33 = vadd.f32 %v1154_v12, %v1146_v5  ;;  %v1358_v5 = vstv %s1753_s18  ;;  %v1368_v12 = vsel %vm328_vm10, %v2488_v52, %v1367_v10 }
 0x1e4   : > { %v2507_v24 = vpop.permute.xlu0 %1385  ;;  %v2516_v29 = vpop.permute.xlu2 %1483  ;;  %v1359_v39 = vmul.f32 %v2509_v20, %v1358_v5 }
 0x1e5   : > { %v2513_v31 = vpop.permute.xlu1 %1375  ;;  %v1160_v23 = vperm.slane %v1156_v33, 2  ;;  %v1159_v32 = vperm.slane %v1156_v33, 1  ;;  %v1158_v38 = vperm.slane %v1156_v33, 0  ;;  %v1387_v52 = vrot.slane %v2507_v24, 1 }
 0x1e6   : > { %v1377_v40 = vrot.slane %v2513_v31, 1 }
 0x1e7   : > { %1165 = vrot.lane.b32.xlu0 %v1160_v23, %s1886_s29  ;;  %1163 = vrot.lane.b32.xlu2 %v1159_v32, %s1886_s29  ;;  %v1455_v23 = vrot.slane %v2481_v49, 1  ;;  %v1388_v7 = vsel %vm350_vm12, %v2507_v24, %v1387_v52 }
 0x1e8   : > { %1161 = vrot.lane.b32.xlu1 %v1158_v38, %s1886_s29  ;;  %v1378_v32 = vsel %vm339_vm11, %v2513_v31, %v1377_v40  ;;  %v1370_v38 = vadd.f32 %v1368_v12, %v1359_v39  ;;  %v1447_v31 = vmul.f32 %v2509_v20, %v1446_v42 }
 0x1e9   : > { %v1456_v55 = vsel %vm328_vm10, %v2481_v49, %v1455_v23 }
 0x1ea   : > { %v1380_v43 = vadd.f32 %v1378_v32, %v1370_v38  ;;  %v1458_v49 = vadd.f32 %v1456_v55, %v1447_v31 }
 0x1ec   : > { %v1318_v19 = vpop.permute.xlu0 %1317  ;;  %v2536_v21 = vpop.permute.xlu2 %1503 }
 0x1ed   : > { %v1230_v60 = vpop.permute.xlu1 %1229  ;;  %v1319_v3 = vrot.slane %v1318_v19, 1 }
 0x1ee   : > { %v1231_v34 = vrot.slane %v1230_v60, 1 }
 0x1ef   : > { %v1320_v17 = vsel %vm372_vm14, %v1318_v19, %v1319_v3  ;;  %v1390_v19 = vadd.f32 %v1388_v7, %v1380_v43 }
 0x1f0   : > { %v1232_v30 = vsel %vm372_vm14, %v1230_v60, %v1231_v34  ;;  %v1322_v36 = vadd.f32 %v1320_v17, %v1312_v4  ;;  %v1475_v60 = vrot.slane %v2497_v14, 1 }
 0x1f1   : > { %v1234_v16 = vadd.f32 %v1232_v30, %v1224_v62 }
 0x1f2   : > { %v1476_v3 = vsel %vm350_vm12, %v2497_v14, %v1475_v60 }
 0x1f3   : > { %v1244_v56 = vadd.f32 %v1242_v0, %v1234_v16  ;;  %v1485_v16 = vrot.slane %v2516_v29, 1 }
 0x1f4   : > { %v1328_v9 = vpop.permute.xlu0 %1327  ;;  %v465_v6 = vpop.permute.xlu2 %464 }
 0x1f5   : > { %v1464_v13 = vpop.permute.xlu1 %1463  ;;  %v1329_v48 = vrot.slane %v1328_v9, 1  ;;  %v1248_v58 = vperm.slane %v1244_v56, 2  ;;  %v1247_v15 = vperm.slane %v1244_v56, 1  ;;  %v1246_v59 = vperm.slane %v1244_v56, 0 }
 0x1f6   : > { %v1465_v61 = vrot.slane %v1464_v13, 1 }
 0x1f7   : > { %v1330_v63 = vsel %vm383_vm15, %v1328_v9, %v1329_v48  ;;  %1253 = vrot.lane.b32.xlu0 %v1248_v58, %s1887_s5  ;;  %1251 = vrot.lane.b32.xlu2 %v1247_v15, %s1887_s5  ;;  %v1486_v15 = vsel %vm361_vm13, %v2516_v29, %v1485_v16  ;;  %v389_v29 = vperm.slane %v2153_v25, 1 }
 0x1f8   : > { %1249 = vrot.lane.b32.xlu1 %v1246_v59, %s1887_s5  ;;  %v1332_v27 = vadd.f32 %v1330_v63, %v1322_v36  ;;  %v1466_v44 = vsel %vm339_vm11, %v1464_v13, %v1465_v61  ;;  %v1505_v59 = vrot.slane %v2536_v21, 1 }
 0x1f9   : > { %v1468_v41 = vadd.f32 %v1466_v44, %v1458_v49 }
 0x1fa   : > { %v1336_v47 = vperm.slane %v1332_v27, 2  ;;  %v1335_v26 = vperm.slane %v1332_v27, 1  ;;  %v1334_v53 = vperm.slane %v1332_v27, 0  ;;  %v1506_v5 = vsel %vm383_vm15, %v2536_v21, %v1505_v59 }
 0x1fb   : > { %v1478_v56 = vadd.f32 %v1476_v3, %v1468_v41 }
 0x1fc   : > { %v1416_v33 = vpop.permute.xlu0 %1415  ;;  %v554_v8 = vpop.permute.xlu2 %553 }
 0x1fd   : > { %v1396_v51 = vpop.permute.xlu1 %1395  ;;  %v1417_v37 = vrot.slane %v1416_v33, 1  ;;  %v1488_v63 = vadd.f32 %v1486_v15, %v1478_v56 }
 0x1fe   : > { %v1397_v22 = vrot.slane %v1396_v51, 1 }
 0x1ff   : > { %1341 = vrot.lane.b32.xlu0 %v1336_v47, %s1888_s4  ;;  %1339 = vrot.lane.b32.xlu2 %v1335_v26, %s1888_s4  ;;  %v1418_v0 = vsel %vm383_vm15, %v1416_v33, %v1417_v37  ;;  %v2596_v47 = vld [vmem:[%s2671_s1 + $0x8] sm:$0x7f] }
 0x200   : > { %1337 = vrot.lane.b32.xlu1 %v1334_v53, %s1888_s4  ;;  %v1398_v45 = vsel %vm361_vm13, %v1396_v51, %v1397_v22  ;;  %v393_v25 = vmul.f32 %v389_v29, %v2596_v47 }
 0x201   : > { %v1400_v34 = vadd.f32 %v1398_v45, %v1390_v19 }
 0x204   : > { %v467_v46 = vpop.permute.xlu0 %466  ;;  %v643_v36 = vpop.permute.xlu2 %642 }
 0x205   : > { %v1406_v18 = vpop.permute.xlu1 %1405  ;;  %v471_v20 = vsel %vm470_vm1, %v465_v6, %v467_v46 }
 0x206   : > { %v1407_v24 = vrot.slane %v1406_v18, 1  ;;  %v475_v35 = vmul.f32 %v471_v20, %v2570_v50 }
 0x208   : > { %v1408_v62 = vsel %vm372_vm14, %v1406_v18, %v1407_v24  ;;  %v479_v2 = vrot.slane %v475_v35, 1 }
 0x209   : > { %v1410_v30 = vadd.f32 %v1408_v62, %v1400_v34  ;;  %v997_v34 = vperm.slane %v2455_v11, 0 }
 0x20a   : > { %v483_v28 = vadd.f32 %v479_v2, %v392_v57 }
 0x20b   : > { %v1420_v4 = vadd.f32 %v1418_v0, %v1410_v30  ;;  %v1001_v16 = vmul.f32 %v997_v34, %v2570_v50 }
 0x20c   : > { %v2581_v17 = vpop.permute.xlu0 %555  ;;  %v732_v21 = vpop.permute.xlu2 %731 }
 0x20d   : > { %v1494_v9 = vpop.permute.xlu1 %1493  ;;  %v1424_v13 = vperm.slane %v1420_v4, 2  ;;  %v1423_v48 = vperm.slane %v1420_v4, 1  ;;  %v1422_v58 = vperm.slane %v1420_v4, 0  ;;  %v560_v52 = vsel %vm559_vm2, %v554_v8, %v2581_v17 }
 0x20e   : > { %v1495_v14 = vrot.slane %v1494_v9, 1  ;;  %v564_v22 = vmul.f32 %v560_v52, %v2570_v50 }
 0x20f   : > { %1429 = vrot.lane.b32.xlu0 %v1424_v13, %s1889_s8  ;;  %1427 = vrot.lane.b32.xlu2 %v1423_v48, %s1889_s8 }
 0x210   : > { %v1496_v10 = vsel %vm372_vm14, %v1494_v9, %v1495_v14  ;;  %1425 = vrot.lane.b32.xlu1 %v1422_v58, %s1889_s8  ;;  %v568_v45 = vrot.slane %v564_v22, 2 }
 0x211   : > { %v1498_v27 = vadd.f32 %v1496_v10, %v1488_v63 }
 0x212   : > { %v572_v19 = vadd.f32 %v568_v45, %v483_v28 }
 0x213   : > { %v1508_v40 = vadd.f32 %v1506_v5, %v1498_v27 }
 0x214   : > { %v645_v6 = vpop.permute.xlu0 %644  ;;  %v821_v43 = vpop.permute.xlu2 %820 }
 0x215   : > { %v469_v12 = vpop.permute.xlu1 %468  ;;  %v1512_v33 = vperm.slane %v1508_v40, 2  ;;  %v1511_v39 = vperm.slane %v1508_v40, 1  ;;  %v1510_v51 = vperm.slane %v1508_v40, 0  ;;  %v649_v61 = vsel %vm648_vm3, %v643_v36, %v645_v6 }
 0x216   : > { %v472_v26 = vsel %vm470_vm1, %v467_v46, %v469_v12  ;;  %v653_v31 = vmul.f32 %v649_v61, %v2570_v50 }
 0x217   : > { %v476_v23 = vmul.f32 %v472_v26, %v2596_v47  ;;  %1517 = vrot.lane.b32.xlu0 %v1512_v33, %s1890_s9  ;;  %1515 = vrot.lane.b32.xlu2 %v1511_v39, %s1890_s9 }
 0x218   : > { %1513 = vrot.lane.b32.xlu1 %v1510_v51, %s1890_s9  ;;  %v657_v49 = vrot.slane %v653_v31, 3 }
 0x219   : > { %v480_v32 = vrot.slane %v476_v23, 1 }
 0x21a   : > { %v661_v20 = vadd.f32 %v657_v49, %v572_v19 }
 0x21b   : > { %v484_v53 = vadd.f32 %v480_v32, %v393_v25 }
 0x21c   : > { %v734_v38 = vpop.permute.xlu0 %733  ;;  %v910_v60 = vpop.permute.xlu2 %909 }
 0x21d   : > { %v558_v42 = vpop.permute.xlu1 %557  ;;  %v738_v55 = vsel %vm737_vm4, %v732_v21, %v734_v38 }
 0x21e   : > { %v742_v46 = vmul.f32 %v738_v55, %v2570_v50  ;;  %v561_v2 = vsel %vm559_vm2, %v2581_v17, %v558_v42 }
 0x21f   : > { %v565_v56 = vmul.f32 %v561_v2, %v2596_v47 }
 0x220   : > { %v746_v18 = vrot.slane %v742_v46, 4 }
 0x221   : > { %v569_v15 = vrot.slane %v565_v56, 2 }
 0x222   : > { %v750_v57 = vadd.f32 %v746_v18, %v661_v20 }
 0x223   : > { %v573_v14 = vadd.f32 %v569_v15, %v484_v53 }
 0x224   : > { %v823_v54 = vpop.permute.xlu0 %822  ;;  %v1074_v21 = vpop.permute.xlu2 %1073 }
 0x225   : > { %v647_v7 = vpop.permute.xlu1 %646  ;;  %v827_v44 = vsel %vm826_vm5, %v821_v43, %v823_v54 }
 0x226   : > { %v831_v8 = vmul.f32 %v827_v44, %v2570_v50  ;;  %v650_v0 = vsel %vm648_vm3, %v645_v6, %v647_v7  ;;  %v998_v6 = vperm.slane %v2455_v11, 1 }
 0x227   : > { %v654_v13 = vmul.f32 %v650_v0, %v2596_v47 }
 0x228   : > { %v835_v37 = vrot.slane %v831_v8, 5  ;;  %v1002_v51 = vmul.f32 %v998_v6, %v2596_v47 }
 0x229   : > { %v658_v59 = vrot.slane %v654_v13, 3 }
 0x22a   : > { %v839_v30 = vadd.f32 %v835_v37, %v750_v57 }
 0x22b   : > { %v662_v10 = vadd.f32 %v658_v59, %v573_v14 }
 0x22c   : > { %v912_v24 = vpop.permute.xlu0 %911 }
 0x22d   : > { %v736_v35 = vpop.permute.xlu1 %735  ;;  %v916_v41 = vsel %vm915_vm6, %v910_v60, %v912_v24 }
 0x22e   : > { %v920_v62 = vmul.f32 %v916_v41, %v2570_v50  ;;  %v739_v4 = vsel %vm737_vm4, %v734_v38, %v736_v35 }
 0x22f   : > { %v743_v17 = vmul.f32 %v739_v4, %v2596_v47 }
 0x230   : > { %v924_v3 = vrot.slane %v920_v62, 6 }
 0x231   : > { %v747_v63 = vrot.slane %v743_v17, 4 }
 0x232   : > { %v928_v28 = vadd.f32 %v924_v3, %v839_v30 }
 0x233   : > { %v751_v29 = vadd.f32 %v747_v63, %v662_v10 }
 0x234   : > { %v1003_v9 = vadd.f32 %v1001_v16, %v928_v28 }
 0x235   : > { %v825_v48 = vpop.permute.xlu1 %824 }
 0x236   : > { %v828_v58 = vsel %vm826_vm5, %v823_v54, %v825_v48 }
 0x237   : > { %v832_v36 = vmul.f32 %v828_v58, %v2596_v47  ;;  %v1076_v25 = vpop.permute.xlu0 %1075 }
 0x238   : > { %v1079_v54 = vsel %vm470_vm1, %v1074_v21, %v1076_v25 }
 0x239   : > { %v836_v27 = vrot.slane %v832_v36, 5  ;;  %v1083_v46 = vmul.f32 %v1079_v54, %v2570_v50 }
 0x23b   : > { %v840_v33 = vadd.f32 %v836_v27, %v751_v29  ;;  %v1087_v34 = vrot.slane %v1083_v46, 1 }
 0x23d   : > { %v914_v5 = vpop.permute.xlu1 %913  ;;  %v1091_v48 = vadd.f32 %v1087_v34, %v1003_v9 }
 0x23e   : > { %v917_v40 = vsel %vm915_vm6, %v912_v24, %v914_v5 }
 0x23f   : > { %v921_v12 = vmul.f32 %v917_v40, %v2596_v47 }
 0x241   : > { %v925_v39 = vrot.slane %v921_v12, 6  ;;  %v1164_v53 = vpop.permute.xlu2 %1163 }
 0x243   : > { %v929_v26 = vadd.f32 %v925_v39, %v840_v33 }
 0x245   : > { %v1004_v23 = vadd.f32 %v1002_v51, %v929_v26  ;;  %v1078_v32 = vpop.permute.xlu1 %1077 }
 0x246   : > { %v1080_v55 = vsel %vm470_vm1, %v1076_v25, %v1078_v32 }
 0x247   : > { %v1084_v44 = vmul.f32 %v1080_v55, %v2596_v47 }
 0x249   : > { %v1088_v37 = vrot.slane %v1084_v44, 1 }
 0x24b   : > { %v1092_v56 = vadd.f32 %v1088_v37, %v1004_v23 }
 0x251   : > { %v1252_v52 = vpop.permute.xlu2 %1251 }
 0x259   : > { %v1166_v38 = vpop.permute.xlu0 %1165  ;;  %v1340_v43 = vpop.permute.xlu2 %1339 }
 0x25a   : > { %v1162_v42 = vpop.permute.xlu1 %1161  ;;  %v1168_v7 = vsel %vm559_vm2, %v1164_v53, %v1166_v38 }
 0x25b   : > { %v1167_v45 = vsel %vm559_vm2, %v1162_v42, %v1164_v53  ;;  %v1172_v8 = vmul.f32 %v1168_v7, %v2596_v47 }
 0x25c   : > { %v1171_v20 = vmul.f32 %v1167_v45, %v2570_v50 }
 0x25d   : > { %v1176_v30 = vrot.slane %v1172_v8, 2 }
 0x25e   : > { %v1175_v0 = vrot.slane %v1171_v20, 2 }
 0x25f   : > { %v1180_v17 = vadd.f32 %v1176_v30, %v1092_v56 }
 0x260   : > { %v1179_v36 = vadd.f32 %v1175_v0, %v1091_v48 }
 0x269   : > { %v1254_v61 = vpop.permute.xlu0 %1253  ;;  %v1428_v18 = vpop.permute.xlu2 %1427 }
 0x26a   : > { %v1250_v22 = vpop.permute.xlu1 %1249  ;;  %v1256_v49 = vsel %vm648_vm3, %v1252_v52, %v1254_v61 }
 0x26b   : > { %v1255_v19 = vsel %vm648_vm3, %v1250_v22, %v1252_v52  ;;  %v1260_v24 = vmul.f32 %v1256_v49, %v2596_v47 }
 0x26c   : > { %v1259_v57 = vmul.f32 %v1255_v19, %v2570_v50 }
 0x26d   : > { %v1264_v4 = vrot.slane %v1260_v24, 3 }
 0x26e   : > { %v1263_v58 = vrot.slane %v1259_v57, 3 }
 0x26f   : > { %v1268_v63 = vadd.f32 %v1264_v4, %v1180_v17 }
 0x270   : > { %v1267_v40 = vadd.f32 %v1263_v58, %v1179_v36 }
 0x271   : > { %v1342_v11 = vpop.permute.xlu0 %1341  ;;  %v1516_v10 = vpop.permute.xlu2 %1515 }
 0x272   : > { %v1338_v31 = vpop.permute.xlu1 %1337  ;;  %v1344_v60 = vsel %vm737_vm4, %v1340_v43, %v1342_v11 }
 0x273   : > { %v1343_v35 = vsel %vm737_vm4, %v1338_v31, %v1340_v43  ;;  %v1348_v3 = vmul.f32 %v1344_v60, %v2596_v47 }
 0x274   : > { %v1347_v28 = vmul.f32 %v1343_v35, %v2570_v50 }
 0x275   : > { %v1352_v59 = vrot.slane %v1348_v3, 4 }
 0x276   : > { %v1351_v14 = vrot.slane %v1347_v28, 4 }
 0x277   : > { %v1356_v33 = vadd.f32 %v1352_v59, %v1268_v63 }
 0x278   : > { %v1355_v51 = vadd.f32 %v1351_v14, %v1267_v40 }
 0x281   : > { %v1430_v41 = vpop.permute.xlu0 %1429 }
 0x282   : > { %v1426_v62 = vpop.permute.xlu1 %1425  ;;  %v1432_v2 = vsel %vm826_vm5, %v1428_v18, %v1430_v41 }
 0x283   : > { %v1431_v16 = vsel %vm826_vm5, %v1426_v62, %v1428_v18  ;;  %v1436_v13 = vmul.f32 %v1432_v2, %v2596_v47 }
 0x284   : > { %v1435_v15 = vmul.f32 %v1431_v16, %v2570_v50 }
 0x285   : > { %v1440_v27 = vrot.slane %v1436_v13, 5 }
 0x286   : > { %v1439_v6 = vrot.slane %v1435_v15, 5 }
 0x287   : > { %v1444_v23 = vadd.f32 %v1440_v27, %v1356_v33 }
 0x288   : > { %v1443_v25 = vadd.f32 %v1439_v6, %v1355_v51 }
 0x289   : > { %v1518_v5 = vpop.permute.xlu0 %1517 }
 0x28a   : > { %v1514_v29 = vpop.permute.xlu1 %1513  ;;  %v1520_v12 = vsel %vm915_vm6, %v1516_v10, %v1518_v5 }
 0x28b   : > { %v1519_v39 = vsel %vm915_vm6, %v1514_v29, %v1516_v10  ;;  %v1524_v9 = vmul.f32 %v1520_v12, %v2596_v47 }
 0x28c   : > { %v1523_v26 = vmul.f32 %v1519_v39, %v2570_v50 }
 0x28d   : > { %v1528_v21 = vrot.slane %v1524_v9, 6 }
 0x28e   : > { %v1527_v32 = vrot.slane %v1523_v26, 6 }
 0x28f   : > { %v1532_v53 = vadd.f32 %v1528_v21, %v1444_v23 }
 0x290   : > { %v1531_v38 = vadd.f32 %v1527_v32, %v1443_v25 }
 0x291   : > { %v1768_v42 = vmul.f32 -1.442695, %v1532_v53 }
 0x292   : > { %v1767_v52 = vmul.f32 -1.442695, %v1531_v38 }
 0x293   : > { %1822 = vpow2.f32 %v1768_v42 }
 0x294   : > { %1824 = vpow2.f32 %v1767_v52 }
 0x299   : > { %v1823_v61 = vpop.eup %1822 }
 0x29a   : > { %v1825_v22 = vpop.eup %1824  ;;  %v1540_v43 = vadd.f32 1.0, %v1823_v61 }
 0x29b   : > { %v1539_v11 = vadd.f32 1.0, %v1825_v22 }
 0x29c   : > { %1826 = vrcp.f32 %v1540_v43  ;;  %v1567_v44 = vand.u32 2147483648, %v1540_v43  ;;  %v1565_v46 = vand.u32 2147483647, %v1540_v43  ;;  %vm1561_vm10 = vweird.f32 %v1540_v43 }
 0x29d   : > { %1828 = vrcp.f32 %v1539_v11  ;;  %v1552_v8 = vand.u32 2147483648, %v1539_v11  ;;  %v1550_v19 = vand.u32 2147483647, %v1539_v11  ;;  %vm1546_vm11 = vweird.f32 %v1539_v11 }
 0x29e   : > { %v1568_v60 = vor.u32 1.1754944e-38, %v1567_v44  ;;  %vm1566_vm14 = vcmp.eq.f32.partialorder %v1565_v46, 8.507059e+37 }
 0x29f   : > { %v1553_v35 = vor.u32 1.1754944e-38, %v1552_v8  ;;  %vm1551_vm15 = vcmp.eq.f32.partialorder %v1550_v19, 8.507059e+37 }
 0x2a2   : > { %v1827_v47 = vpop.eup %1826 }
 0x2a3   : > { %v1829_v55 = vpop.eup %1828  ;;  %v1557_v31 = vmul.f32 %v1827_v47, %v1540_v43  ;;  %vm1562_vm7 = vweird.f32 %v1827_v47 }
 0x2a4   : > { %v1542_v50 = vmul.f32 %v1829_v55, %v1539_v11  ;;  %vm1547_vm9 = vweird.f32 %v1829_v55  ;;  %vm1563_vm12 = vmor %vm1561_vm10, %vm1562_vm7 }
 0x2a5   : > { %v1558_v54 = vsub.f32 1.0, %v1557_v31  ;;  %vm1548_vm13 = vmor %vm1546_vm11, %vm1547_vm9 }
 0x2a6   : > { %v1543_v7 = vsub.f32 1.0, %v1542_v50 }
 0x2a7   : > { %v1559_v45 = vmul.f32 %v1827_v47, %v1558_v54 }
 0x2a8   : > { %v1544_v49 = vmul.f32 %v1829_v55, %v1543_v7 }
 0x2a9   : > { %v1560_v18 = vadd.f32 %v1827_v47, %v1559_v45 }
 0x2aa   : > { %v1545_v20 = vadd.f32 %v1829_v55, %v1544_v49 }
 0x2ab   : > { %v1564_v37 = vsel %vm1563_vm12, %v1827_v47, %v1560_v18 }
 0x2ac   : > { %v1549_v24 = vsel %vm1548_vm13, %v1829_v55, %v1545_v20  ;;  %v1569_v41 = vsel %vm1566_vm14, %v1568_v60, %v1564_v37 }
 0x2ad   : > { %v1573_v34 = vrot.slane %v1569_v41, 7  ;;  %v1554_v57 = vsel %vm1551_vm15, %v1553_v35, %v1549_v24 }
 0x2af   : > { %v1574_v62 = vsel %vm245_vm8, %v1554_v57, %v1573_v34 }
 0x2b0   : > { %1576 = vst.msk [vmem:[%s208_s6] sm:$0x3] %vm1935_vm0, %v1574_v62 }
 0x2b1 PF: > { %s14_s14 = sadd.s32 1, %s1873_s14   ;;  %s2684_s12 = smov %s1869_s13 }
 0x2b2   : > { %p11_p8 = scmp.ge.s32.totalorder %s14_s14, 4   ;;  %s2685_s13 = smov %s2687_s16 }
 0x2b4   :  { %13 = sbr.rel (!%p11_p8) target bundleno = 2 (0x2), region = 75 }
 0x2b9   :  { %1596 = vsyncpa [#allocation7], 1 }
 0x2ba   :  { %1598 = vsyncpa [#allocation7 + $0x1], 1 }

</bundles_post_ra>
